<compile_context>
chip_gen: v7x
topology: tpu7x:2x2x1
jax: 0.10.0
libtpu: 0.0.40
codegen_flags: <defaults>
</compile_context>

<pallas_src>
import jax
import jax.numpy as jnp
from jax import lax
from jax.experimental import pallas as pl
from jax.experimental.pallas import tpu as pltpu

# ---- small, module-consistent sizes ----------------------------------------
B, T, C, HI, WI = 2, 8, 4, 16, 16
HW = HI * WI
FEAT = 64      # stands in for feature_size=512
HID = 32       # stands in for hidden_size=256
NCLS = 2       # num_classes
GPAD = 128     # fused 3*HID = 96 gate width, padded to one full lane tile
NPAD = 128     # classifier output width, padded to one full lane tile


# ------------------------------ fused kernel ---------------------------------
def fused_kernel(x_ref, wf_ref, bf_ref, wi_ref, bi_ref, wh_ref, bh_ref,
                 wc_ref, bc_ref, out_ref, xp_ref):
    # ---- feature extraction: pool + project as ONE contraction --------------
    # x_ref: (T*B, C*H*W), wf_ref already carries the 1/(H*W) pooling factor.
    feats = (jnp.dot(x_ref[...], wf_ref[...],
                     preferred_element_type=jnp.float32)
             + bf_ref[...])                                     # (T*B, FEAT)

    # ---- hoisted input->hidden projection for ALL timesteps (one matmul) ----
    xp_ref[...] = (jnp.dot(feats, wi_ref[...],
                           preferred_element_type=jnp.float32)
                   + bi_ref[...])                               # (T*B, GPAD)

    wh = wh_ref[...]                                            # (HID, GPAD)
    bh = bh_ref[...]                                            # (1, GPAD)

    def step(t, h):
        # rows [t*B, (t+1)*B) of the precomputed projection (time-major layout)
        xg = xp_ref[pl.ds(t * B, B), :]                         # (B, GPAD)
        hg = jnp.dot(h, wh, preferred_element_type=jnp.float32) + bh
        rz = jax.nn.sigmoid(xg[:, :2 * HID] + hg[:, :2 * HID])
        r = rz[:, :HID]
        z = rz[:, HID:2 * HID]
        n = jnp.tanh(xg[:, 2 * HID:3 * HID] + r * hg[:, 2 * HID:3 * HID])
        return (1.0 - z) * n + z * h                            # (B, HID)

    h_last = lax.fori_loop(0, T, step, jnp.zeros((B, HID), jnp.float32),
                           unroll=True)

    # ---- classifier fused on the final hidden state (lane-dense output) -----
    out_ref[...] = (jnp.dot(h_last, wc_ref[...],
                            preferred_element_type=jnp.float32)
                    + bc_ref[...])                              # (B, NPAD)


def _fused_forward(x2d, fp):
    def full(shape):
        return pl.BlockSpec(shape, lambda i, _s=shape: (0,) * len(_s))

    return pl.pallas_call(
        fused_kernel,
        out_shape=jax.ShapeDtypeStruct((B, NPAD), jnp.float32),
        grid=(1,),
        in_specs=[
            full((T * B, C * HW)),     # x2d
            full((C * HW, FEAT)),      # wf (pooling folded in)
            full((1, FEAT)),           # bf
            full((FEAT, GPAD)),        # wi = [wir|wiz|win], padded
            full((1, GPAD)),           # bi
            full((HID, GPAD)),         # wh = [whr|whz|whn], padded
            full((1, GPAD)),           # bh
            full((HID, NPAD)),         # wc, padded
            full((1, NPAD)),           # bc, padded
        ],
        out_specs=full((B, NPAD)),
        scratch_shapes=[pltpu.VMEM((T * B, GPAD), jnp.float32)],
        compiler_params=pltpu.CompilerParams(
            dimension_semantics=("arbitrary",)),
    )(x2d, fp["wf"], fp["bf"], fp["wi"], fp["bi"], fp["wh"], fp["bh"],
      fp["wc"], fp["bc"])


# ------------------------------- full forward --------------------------------
@jax.jit
def gru_classifier_forward(x, fp):
    Bn, Tn, Cc, Hh, Ww = x.shape
    # Time-major rows so step t reads a contiguous (B, GPAD) sublane slab.
    x2d = x.transpose(1, 0, 2, 3, 4).reshape(Tn * Bn, Cc * Hh * Ww)
    logits_pad = _fused_forward(x2d.astype(jnp.float32), fp)
    return logits_pad[:, :NCLS]


# ------------------------- parameter fusion (one-time) ------------------------
def fuse_params(p):
    """Fold pooling into the projection weight; fuse & pad GRU/classifier."""
    wf = jnp.repeat(p["wp"], HW, axis=0) / HW                      # (C*HW, FEAT)
    wi = jnp.concatenate([p["wir"], p["wiz"], p["win"]], axis=1)   # (FEAT, 3H)
    wh = jnp.concatenate([p["whr"], p["whz"], p["whn"]], axis=1)   # (HID, 3H)
    bi = p["bi"].reshape(1, 3 * HID)                               # [b_ir|b_iz|b_in]
    bh = p["bh"].reshape(1, 3 * HID)                               # [b_hr|b_hz|b_hn]
    pad_g = ((0, 0), (0, GPAD - 3 * HID))
    pad_c = ((0, 0), (0, NPAD - NCLS))
    return {
        "wf": wf, "bf": p["bp"],
        "wi": jnp.pad(wi, pad_g), "bi": jnp.pad(bi, pad_g),
        "wh": jnp.pad(wh, pad_g), "bh": jnp.pad(bh, pad_g),
        "wc": jnp.pad(p["wc"], pad_c), "bc": jnp.pad(p["bc"], pad_c),
    }


# ------------------------------ pure-JAX reference ---------------------------
def reference_forward(x, p):
    Bn, Tn, Cc, Hh, Ww = x.shape
    pooled = x.reshape(Bn * Tn, Cc, Hh * Ww).mean(-1)
    feats = (pooled @ p["wp"] + p["bp"]).reshape(Bn, Tn, FEAT)
    h = jnp.zeros((Bn, HID), jnp.float32)
    for t in range(Tn):
        xt = feats[:, t, :]
        r = jax.nn.sigmoid(xt @ p["wir"] + p["bi"][0] + h @ p["whr"] + p["bh"][0])
        z = jax.nn.sigmoid(xt @ p["wiz"] + p["bi"][1] + h @ p["whz"] + p["bh"][1])
        n = jnp.tanh(xt @ p["win"] + p["bi"][2] + r * (h @ p["whn"] + p["bh"][2]))
        h = (1.0 - z) * n + z * h
    return h @ p["wc"] + p["bc"]


def init_params(key):
    ks = jax.random.split(key, 12)
    s = 0.1
    return {
        "wp":  s * jax.random.normal(ks[0], (C, FEAT), jnp.float32),
        "bp":  s * jax.random.normal(ks[1], (1, FEAT), jnp.float32),
        "wir": s * jax.random.normal(ks[2], (FEAT, HID), jnp.float32),
        "wiz": s * jax.random.normal(ks[3], (FEAT, HID), jnp.float32),
        "win": s * jax.random.normal(ks[4], (FEAT, HID), jnp.float32),
        "whr": s * jax.random.normal(ks[5], (HID, HID), jnp.float32),
        "whz": s * jax.random.normal(ks[6], (HID, HID), jnp.float32),
        "whn": s * jax.random.normal(ks[7], (HID, HID), jnp.float32),
        "bi":  s * jax.random.normal(ks[8], (3, HID), jnp.float32),
        "bh":  s * jax.random.normal(ks[9], (3, HID), jnp.float32),
        "wc":  s * jax.random.normal(ks[10], (HID, NCLS), jnp.float32),
        "bc":  s * jax.random.normal(ks[11], (1, NCLS), jnp.float32),
    }


if __name__ == "__main__":
    key = jax.random.PRNGKey(0)
    k_x, k_p = jax.random.split(key)
    x = jax.random.normal(k_x, (B, T, C, HI, WI), jnp.float32)
    params = init_params(k_p)
    fused = fuse_params(params)

    out = jax.block_until_ready(gru_classifier_forward(x, fused))
    ref = reference_forward(x, params)

    assert out.shape == (B, NCLS), out.shape
    assert jnp.allclose(out, ref, rtol=1e-4, atol=1e-4), (out, ref)
    print("KERNEL_OK")
</pallas_src>

<mosaic_0001>
module attributes {stable_mosaic.version = 11 : i64} {
  func.func @fused_kernel(%arg0: i32, %arg1: memref<16x1024xf32, #tpu.memory_space<vmem>>, %arg2: memref<1024x64xf32, #tpu.memory_space<vmem>>, %arg3: memref<1x64xf32, #tpu.memory_space<vmem>>, %arg4: memref<64x128xf32, #tpu.memory_space<vmem>>, %arg5: memref<1x128xf32, #tpu.memory_space<vmem>>, %arg6: memref<32x128xf32, #tpu.memory_space<vmem>>, %arg7: memref<1x128xf32, #tpu.memory_space<vmem>>, %arg8: memref<32x128xf32, #tpu.memory_space<vmem>>, %arg9: memref<1x128xf32, #tpu.memory_space<vmem>>, %arg10: memref<2x128xf32, #tpu.memory_space<vmem>>, %arg11: memref<16x128xf32, #tpu.memory_space<vmem>>) attributes {dimension_semantics = [#tpu.dimension_semantics<arbitrary>], iteration_bounds = array<i64: 1>, scalar_prefetch = 0 : i64, scratch_operands = 1 : i64, tpu.core_type = #tpu.core_type<tc>, window_params = [{pipeline_mode = #tpu.pipeline_mode<synchronous>, transform_indices = @transform_0, window_bounds = array<i64: 16, 1024>}, {pipeline_mode = #tpu.pipeline_mode<synchronous>, transform_indices = @transform_1, window_bounds = array<i64: 1024, 64>}, {pipeline_mode = #tpu.pipeline_mode<synchronous>, transform_indices = @transform_2, window_bounds = array<i64: 1, 64>}, {pipeline_mode = #tpu.pipeline_mode<synchronous>, transform_indices = @transform_3, window_bounds = array<i64: 64, 128>}, {pipeline_mode = #tpu.pipeline_mode<synchronous>, transform_indices = @transform_4, window_bounds = array<i64: 1, 128>}, {pipeline_mode = #tpu.pipeline_mode<synchronous>, transform_indices = @transform_5, window_bounds = array<i64: 32, 128>}, {pipeline_mode = #tpu.pipeline_mode<synchronous>, transform_indices = @transform_6, window_bounds = array<i64: 1, 128>}, {pipeline_mode = #tpu.pipeline_mode<synchronous>, transform_indices = @transform_7, window_bounds = array<i64: 32, 128>}, {pipeline_mode = #tpu.pipeline_mode<synchronous>, transform_indices = @transform_8, window_bounds = array<i64: 1, 128>}, {pipeline_mode = #tpu.pipeline_mode<synchronous>, transform_indices = @transform_9, window_bounds = array<i64: 2, 128>}]} {
    %c0 = arith.constant 0 : index
    %c0_0 = arith.constant 0 : index
    %0 = vector.load %arg1[%c0, %c0_0] : memref<16x1024xf32, #tpu.memory_space<vmem>>, vector<16x1024xf32>
    %c0_1 = arith.constant 0 : index
    %c0_2 = arith.constant 0 : index
    %1 = vector.load %arg2[%c0_1, %c0_2] : memref<1024x64xf32, #tpu.memory_space<vmem>>, vector<1024x64xf32>
    %cst = arith.constant dense<0.000000e+00> : vector<16x64xf32>
    %2 = tpu.matmul %0, %1, %cst {dimension_numbers = #tpu.dot_dimension_numbers<[1], [0], [0], [1], [0, 0, 1, 1], [], []>} : vector<16x1024xf32>, vector<1024x64xf32>, vector<16x64xf32> -> vector<16x64xf32>
    %c0_3 = arith.constant 0 : index
    %c0_4 = arith.constant 0 : index
    %3 = vector.load %arg3[%c0_3, %c0_4] : memref<1x64xf32, #tpu.memory_space<vmem>>, vector<1x64xf32>
    %4 = vector.broadcast %3 : vector<1x64xf32> to vector<16x64xf32>
    %5 = arith.addf %2, %4 : vector<16x64xf32>
    %c0_5 = arith.constant 0 : index
    %c0_6 = arith.constant 0 : index
    %6 = vector.load %arg4[%c0_5, %c0_6] : memref<64x128xf32, #tpu.memory_space<vmem>>, vector<64x128xf32>
    %cst_7 = arith.constant dense<0.000000e+00> : vector<16x128xf32>
    %7 = tpu.matmul %5, %6, %cst_7 {dimension_numbers = #tpu.dot_dimension_numbers<[1], [0], [0], [1], [0, 0, 1, 1], [], []>} : vector<16x64xf32>, vector<64x128xf32>, vector<16x128xf32> -> vector<16x128xf32>
    %c0_8 = arith.constant 0 : index
    %c0_9 = arith.constant 0 : index
    %8 = vector.load %arg5[%c0_8, %c0_9] : memref<1x128xf32, #tpu.memory_space<vmem>>, vector<1x128xf32>
    %9 = vector.broadcast %8 : vector<1x128xf32> to vector<16x128xf32>
    %10 = arith.addf %7, %9 : vector<16x128xf32>
    %c0_10 = arith.constant 0 : index
    %c0_11 = arith.constant 0 : index
    %11 = vector.load %arg11[%c0_10, %c0_11] : memref<16x128xf32, #tpu.memory_space<vmem>>, vector<16x128xf32>
    tpu.vector_store %arg11[%c0_10, %c0_11], %10 {strides = array<i32>} : memref<16x128xf32, #tpu.memory_space<vmem>>, vector<16x128xf32>,
    %c0_12 = arith.constant 0 : index
    %c0_13 = arith.constant 0 : index
    %12 = vector.load %arg6[%c0_12, %c0_13] : memref<32x128xf32, #tpu.memory_space<vmem>>, vector<32x128xf32>
    %c0_14 = arith.constant 0 : index
    %c0_15 = arith.constant 0 : index
    %13 = vector.load %arg7[%c0_14, %c0_15] : memref<1x128xf32, #tpu.memory_space<vmem>>, vector<1x128xf32>
    %cst_16 = arith.constant 0.000000e+00 : f32
    %14 = vector.broadcast %cst_16 : f32 to vector<2x32xf32>
    %c0_i32 = arith.constant 0 : i32
    %c2_i32 = arith.constant 2 : i32
    %15 = arith.muli %c0_i32, %c2_i32 : i32
    %16 = arith.index_cast %15 : i32 to index
    %c0_17 = arith.constant 0 : index
    %17 = vector.load %arg11[%16, %c0_17] : memref<16x128xf32, #tpu.memory_space<vmem>>, vector<2x128xf32>
    %cst_18 = arith.constant dense<0.000000e+00> : vector<2x128xf32>
    %18 = tpu.matmul %14, %12, %cst_18 {dimension_numbers = #tpu.dot_dimension_numbers<[1], [0], [0], [1], [0, 0, 1, 1], [], []>} : vector<2x32xf32>, vector<32x128xf32>, vector<2x128xf32> -> vector<2x128xf32>
    %19 = vector.broadcast %13 : vector<1x128xf32> to vector<2x128xf32>
    %20 = arith.addf %18, %19 : vector<2x128xf32>
    %21 = vector.extract_strided_slice %17 {offsets = [0, 0], sizes = [2, 64], strides = [1, 1]} : vector<2x128xf32> to vector<2x64xf32>
    %22 = vector.extract_strided_slice %20 {offsets = [0, 0], sizes = [2, 64], strides = [1, 1]} : vector<2x128xf32> to vector<2x64xf32>
    %23 = arith.addf %21, %22 : vector<2x64xf32>
    %24 = arith.negf %23 : vector<2x64xf32>
    %25 = math.exp %24 : vector<2x64xf32>
    %cst_19 = arith.constant 1.000000e+00 : f32
    %26 = vector.broadcast %cst_19 : f32 to vector<2x64xf32>
    %27 = arith.addf %26, %25 : vector<2x64xf32>
    %28 = arith.divf %26, %27 : vector<2x64xf32>
    %29 = vector.extract_strided_slice %28 {offsets = [0, 0], sizes = [2, 32], strides = [1, 1]} : vector<2x64xf32> to vector<2x32xf32>
    %30 = vector.extract_strided_slice %28 {offsets = [0, 32], sizes = [2, 32], strides = [1, 1]} : vector<2x64xf32> to vector<2x32xf32>
    %31 = vector.extract_strided_slice %17 {offsets = [0, 64], sizes = [2, 32], strides = [1, 1]} : vector<2x128xf32> to vector<2x32xf32>
    %32 = vector.extract_strided_slice %20 {offsets = [0, 64], sizes = [2, 32], strides = [1, 1]} : vector<2x128xf32> to vector<2x32xf32>
    %33 = arith.mulf %29, %32 : vector<2x32xf32>
    %34 = arith.addf %31, %33 : vector<2x32xf32>
    %35 = math.tanh %34 : vector<2x32xf32>
    %cst_20 = arith.constant 1.000000e+00 : f32
    %36 = vector.broadcast %cst_20 : f32 to vector<2x32xf32>
    %37 = arith.subf %36, %30 : vector<2x32xf32>
    %38 = arith.mulf %37, %35 : vector<2x32xf32>
    %39 = arith.mulf %30, %14 : vector<2x32xf32>
    %40 = arith.addf %38, %39 : vector<2x32xf32>
    %c1_i32 = arith.constant 1 : i32
    %c2_i32_21 = arith.constant 2 : i32
    %41 = arith.muli %c1_i32, %c2_i32_21 : i32
    %42 = arith.index_cast %41 : i32 to index
    %c0_22 = arith.constant 0 : index
    %43 = vector.load %arg11[%42, %c0_22] : memref<16x128xf32, #tpu.memory_space<vmem>>, vector<2x128xf32>
    %cst_23 = arith.constant dense<0.000000e+00> : vector<2x128xf32>
    %44 = tpu.matmul %40, %12, %cst_23 {dimension_numbers = #tpu.dot_dimension_numbers<[1], [0], [0], [1], [0, 0, 1, 1], [], []>} : vector<2x32xf32>, vector<32x128xf32>, vector<2x128xf32> -> vector<2x128xf32>
    %45 = vector.broadcast %13 : vector<1x128xf32> to vector<2x128xf32>
    %46 = arith.addf %44, %45 : vector<2x128xf32>
    %47 = vector.extract_strided_slice %43 {offsets = [0, 0], sizes = [2, 64], strides = [1, 1]} : vector<2x128xf32> to vector<2x64xf32>
    %48 = vector.extract_strided_slice %46 {offsets = [0, 0], sizes = [2, 64], strides = [1, 1]} : vector<2x128xf32> to vector<2x64xf32>
    %49 = arith.addf %47, %48 : vector<2x64xf32>
    %50 = arith.negf %49 : vector<2x64xf32>
    %51 = math.exp %50 : vector<2x64xf32>
    %cst_24 = arith.constant 1.000000e+00 : f32
    %52 = vector.broadcast %cst_24 : f32 to vector<2x64xf32>
    %53 = arith.addf %52, %51 : vector<2x64xf32>
    %54 = arith.divf %52, %53 : vector<2x64xf32>
    %55 = vector.extract_strided_slice %54 {offsets = [0, 0], sizes = [2, 32], strides = [1, 1]} : vector<2x64xf32> to vector<2x32xf32>
    %56 = vector.extract_strided_slice %54 {offsets = [0, 32], sizes = [2, 32], strides = [1, 1]} : vector<2x64xf32> to vector<2x32xf32>
    %57 = vector.extract_strided_slice %43 {offsets = [0, 64], sizes = [2, 32], strides = [1, 1]} : vector<2x128xf32> to vector<2x32xf32>
    %58 = vector.extract_strided_slice %46 {offsets = [0, 64], sizes = [2, 32], strides = [1, 1]} : vector<2x128xf32> to vector<2x32xf32>
    %59 = arith.mulf %55, %58 : vector<2x32xf32>
    %60 = arith.addf %57, %59 : vector<2x32xf32>
    %61 = math.tanh %60 : vector<2x32xf32>
    %cst_25 = arith.constant 1.000000e+00 : f32
    %62 = vector.broadcast %cst_25 : f32 to vector<2x32xf32>
    %63 = arith.subf %62, %56 : vector<2x32xf32>
    %64 = arith.mulf %63, %61 : vector<2x32xf32>
    %65 = arith.mulf %56, %40 : vector<2x32xf32>
    %66 = arith.addf %64, %65 : vector<2x32xf32>
    %c2_i32_26 = arith.constant 2 : i32
    %c2_i32_27 = arith.constant 2 : i32
    %67 = arith.muli %c2_i32_26, %c2_i32_27 : i32
    %68 = arith.index_cast %67 : i32 to index
    %c0_28 = arith.constant 0 : index
    %69 = vector.load %arg11[%68, %c0_28] : memref<16x128xf32, #tpu.memory_space<vmem>>, vector<2x128xf32>
    %cst_29 = arith.constant dense<0.000000e+00> : vector<2x128xf32>
    %70 = tpu.matmul %66, %12, %cst_29 {dimension_numbers = #tpu.dot_dimension_numbers<[1], [0], [0], [1], [0, 0, 1, 1], [], []>} : vector<2x32xf32>, vector<32x128xf32>, vector<2x128xf32> -> vector<2x128xf32>
    %71 = vector.broadcast %13 : vector<1x128xf32> to vector<2x128xf32>
    %72 = arith.addf %70, %71 : vector<2x128xf32>
    %73 = vector.extract_strided_slice %69 {offsets = [0, 0], sizes = [2, 64], strides = [1, 1]} : vector<2x128xf32> to vector<2x64xf32>
    %74 = vector.extract_strided_slice %72 {offsets = [0, 0], sizes = [2, 64], strides = [1, 1]} : vector<2x128xf32> to vector<2x64xf32>
    %75 = arith.addf %73, %74 : vector<2x64xf32>
    %76 = arith.negf %75 : vector<2x64xf32>
    %77 = math.exp %76 : vector<2x64xf32>
    %cst_30 = arith.constant 1.000000e+00 : f32
    %78 = vector.broadcast %cst_30 : f32 to vector<2x64xf32>
    %79 = arith.addf %78, %77 : vector<2x64xf32>
    %80 = arith.divf %78, %79 : vector<2x64xf32>
    %81 = vector.extract_strided_slice %80 {offsets = [0, 0], sizes = [2, 32], strides = [1, 1]} : vector<2x64xf32> to vector<2x32xf32>
    %82 = vector.extract_strided_slice %80 {offsets = [0, 32], sizes = [2, 32], strides = [1, 1]} : vector<2x64xf32> to vector<2x32xf32>
    %83 = vector.extract_strided_slice %69 {offsets = [0, 64], sizes = [2, 32], strides = [1, 1]} : vector<2x128xf32> to vector<2x32xf32>
    %84 = vector.extract_strided_slice %72 {offsets = [0, 64], sizes = [2, 32], strides = [1, 1]} : vector<2x128xf32> to vector<2x32xf32>
    %85 = arith.mulf %81, %84 : vector<2x32xf32>
    %86 = arith.addf %83, %85 : vector<2x32xf32>
    %87 = math.tanh %86 : vector<2x32xf32>
    %cst_31 = arith.constant 1.000000e+00 : f32
    %88 = vector.broadcast %cst_31 : f32 to vector<2x32xf32>
    %89 = arith.subf %88, %82 : vector<2x32xf32>
    %90 = arith.mulf %89, %87 : vector<2x32xf32>
    %91 = arith.mulf %82, %66 : vector<2x32xf32>
    %92 = arith.addf %90, %91 : vector<2x32xf32>
    %c3_i32 = arith.constant 3 : i32
    %c2_i32_32 = arith.constant 2 : i32
    %93 = arith.muli %c3_i32, %c2_i32_32 : i32
    %94 = arith.index_cast %93 : i32 to index
    %c0_33 = arith.constant 0 : index
    %95 = vector.load %arg11[%94, %c0_33] : memref<16x128xf32, #tpu.memory_space<vmem>>, vector<2x128xf32>
    %cst_34 = arith.constant dense<0.000000e+00> : vector<2x128xf32>
    %96 = tpu.matmul %92, %12, %cst_34 {dimension_numbers = #tpu.dot_dimension_numbers<[1], [0], [0], [1], [0, 0, 1, 1], [], []>} : vector<2x32xf32>, vector<32x128xf32>, vector<2x128xf32> -> vector<2x128xf32>
    %97 = vector.broadcast %13 : vector<1x128xf32> to vector<2x128xf32>
    %98 = arith.addf %96, %97 : vector<2x128xf32>
    %99 = vector.extract_strided_slice %95 {offsets = [0, 0], sizes = [2, 64], strides = [1, 1]} : vector<2x128xf32> to vector<2x64xf32>
    %100 = vector.extract_strided_slice %98 {offsets = [0, 0], sizes = [2, 64], strides = [1, 1]} : vector<2x128xf32> to vector<2x64xf32>
    %101 = arith.addf %99, %100 : vector<2x64xf32>
    %102 = arith.negf %101 : vector<2x64xf32>
    %103 = math.exp %102 : vector<2x64xf32>
    %cst_35 = arith.constant 1.000000e+00 : f32
    %104 = vector.broadcast %cst_35 : f32 to vector<2x64xf32>
    %105 = arith.addf %104, %103 : vector<2x64xf32>
    %106 = arith.divf %104, %105 : vector<2x64xf32>
    %107 = vector.extract_strided_slice %106 {offsets = [0, 0], sizes = [2, 32], strides = [1, 1]} : vector<2x64xf32> to vector<2x32xf32>
    %108 = vector.extract_strided_slice %106 {offsets = [0, 32], sizes = [2, 32], strides = [1, 1]} : vector<2x64xf32> to vector<2x32xf32>
    %109 = vector.extract_strided_slice %95 {offsets = [0, 64], sizes = [2, 32], strides = [1, 1]} : vector<2x128xf32> to vector<2x32xf32>
    %110 = vector.extract_strided_slice %98 {offsets = [0, 64], sizes = [2, 32], strides = [1, 1]} : vector<2x128xf32> to vector<2x32xf32>
    %111 = arith.mulf %107, %110 : vector<2x32xf32>
    %112 = arith.addf %109, %111 : vector<2x32xf32>
    %113 = math.tanh %112 : vector<2x32xf32>
    %cst_36 = arith.constant 1.000000e+00 : f32
    %114 = vector.broadcast %cst_36 : f32 to vector<2x32xf32>
    %115 = arith.subf %114, %108 : vector<2x32xf32>
    %116 = arith.mulf %115, %113 : vector<2x32xf32>
    %117 = arith.mulf %108, %92 : vector<2x32xf32>
    %118 = arith.addf %116, %117 : vector<2x32xf32>
    %c4_i32 = arith.constant 4 : i32
    %c2_i32_37 = arith.constant 2 : i32
    %119 = arith.muli %c4_i32, %c2_i32_37 : i32
    %120 = arith.index_cast %119 : i32 to index
    %c0_38 = arith.constant 0 : index
    %121 = vector.load %arg11[%120, %c0_38] : memref<16x128xf32, #tpu.memory_space<vmem>>, vector<2x128xf32>
    %cst_39 = arith.constant dense<0.000000e+00> : vector<2x128xf32>
    %122 = tpu.matmul %118, %12, %cst_39 {dimension_numbers = #tpu.dot_dimension_numbers<[1], [0], [0], [1], [0, 0, 1, 1], [], []>} : vector<2x32xf32>, vector<32x128xf32>, vector<2x128xf32> -> vector<2x128xf32>
    %123 = vector.broadcast %13 : vector<1x128xf32> to vector<2x128xf32>
    %124 = arith.addf %122, %123 : vector<2x128xf32>
    %125 = vector.extract_strided_slice %121 {offsets = [0, 0], sizes = [2, 64], strides = [1, 1]} : vector<2x128xf32> to vector<2x64xf32>
    %126 = vector.extract_strided_slice %124 {offsets = [0, 0], sizes = [2, 64], strides = [1, 1]} : vector<2x128xf32> to vector<2x64xf32>
    %127 = arith.addf %125, %126 : vector<2x64xf32>
    %128 = arith.negf %127 : vector<2x64xf32>
    %129 = math.exp %128 : vector<2x64xf32>
    %cst_40 = arith.constant 1.000000e+00 : f32
    %130 = vector.broadcast %cst_40 : f32 to vector<2x64xf32>
    %131 = arith.addf %130, %129 : vector<2x64xf32>
    %132 = arith.divf %130, %131 : vector<2x64xf32>
    %133 = vector.extract_strided_slice %132 {offsets = [0, 0], sizes = [2, 32], strides = [1, 1]} : vector<2x64xf32> to vector<2x32xf32>
    %134 = vector.extract_strided_slice %132 {offsets = [0, 32], sizes = [2, 32], strides = [1, 1]} : vector<2x64xf32> to vector<2x32xf32>
    %135 = vector.extract_strided_slice %121 {offsets = [0, 64], sizes = [2, 32], strides = [1, 1]} : vector<2x128xf32> to vector<2x32xf32>
    %136 = vector.extract_strided_slice %124 {offsets = [0, 64], sizes = [2, 32], strides = [1, 1]} : vector<2x128xf32> to vector<2x32xf32>
    %137 = arith.mulf %133, %136 : vector<2x32xf32>
    %138 = arith.addf %135, %137 : vector<2x32xf32>
    %139 = math.tanh %138 : vector<2x32xf32>
    %cst_41 = arith.constant 1.000000e+00 : f32
    %140 = vector.broadcast %cst_41 : f32 to vector<2x32xf32>
    %141 = arith.subf %140, %134 : vector<2x32xf32>
    %142 = arith.mulf %141, %139 : vector<2x32xf32>
    %143 = arith.mulf %134, %118 : vector<2x32xf32>
    %144 = arith.addf %142, %143 : vector<2x32xf32>
    %c5_i32 = arith.constant 5 : i32
    %c2_i32_42 = arith.constant 2 : i32
    %145 = arith.muli %c5_i32, %c2_i32_42 : i32
    %146 = arith.index_cast %145 : i32 to index
    %c0_43 = arith.constant 0 : index
    %147 = vector.load %arg11[%146, %c0_43] : memref<16x128xf32, #tpu.memory_space<vmem>>, vector<2x128xf32>
    %cst_44 = arith.constant dense<0.000000e+00> : vector<2x128xf32>
    %148 = tpu.matmul %144, %12, %cst_44 {dimension_numbers = #tpu.dot_dimension_numbers<[1], [0], [0], [1], [0, 0, 1, 1], [], []>} : vector<2x32xf32>, vector<32x128xf32>, vector<2x128xf32> -> vector<2x128xf32>
    %149 = vector.broadcast %13 : vector<1x128xf32> to vector<2x128xf32>
    %150 = arith.addf %148, %149 : vector<2x128xf32>
    %151 = vector.extract_strided_slice %147 {offsets = [0, 0], sizes = [2, 64], strides = [1, 1]} : vector<2x128xf32> to vector<2x64xf32>
    %152 = vector.extract_strided_slice %150 {offsets = [0, 0], sizes = [2, 64], strides = [1, 1]} : vector<2x128xf32> to vector<2x64xf32>
    %153 = arith.addf %151, %152 : vector<2x64xf32>
    %154 = arith.negf %153 : vector<2x64xf32>
    %155 = math.exp %154 : vector<2x64xf32>
    %cst_45 = arith.constant 1.000000e+00 : f32
    %156 = vector.broadcast %cst_45 : f32 to vector<2x64xf32>
    %157 = arith.addf %156, %155 : vector<2x64xf32>
    %158 = arith.divf %156, %157 : vector<2x64xf32>
    %159 = vector.extract_strided_slice %158 {offsets = [0, 0], sizes = [2, 32], strides = [1, 1]} : vector<2x64xf32> to vector<2x32xf32>
    %160 = vector.extract_strided_slice %158 {offsets = [0, 32], sizes = [2, 32], strides = [1, 1]} : vector<2x64xf32> to vector<2x32xf32>
    %161 = vector.extract_strided_slice %147 {offsets = [0, 64], sizes = [2, 32], strides = [1, 1]} : vector<2x128xf32> to vector<2x32xf32>
    %162 = vector.extract_strided_slice %150 {offsets = [0, 64], sizes = [2, 32], strides = [1, 1]} : vector<2x128xf32> to vector<2x32xf32>
    %163 = arith.mulf %159, %162 : vector<2x32xf32>
    %164 = arith.addf %161, %163 : vector<2x32xf32>
    %165 = math.tanh %164 : vector<2x32xf32>
    %cst_46 = arith.constant 1.000000e+00 : f32
    %166 = vector.broadcast %cst_46 : f32 to vector<2x32xf32>
    %167 = arith.subf %166, %160 : vector<2x32xf32>
    %168 = arith.mulf %167, %165 : vector<2x32xf32>
    %169 = arith.mulf %160, %144 : vector<2x32xf32>
    %170 = arith.addf %168, %169 : vector<2x32xf32>
    %c6_i32 = arith.constant 6 : i32
    %c2_i32_47 = arith.constant 2 : i32
    %171 = arith.muli %c6_i32, %c2_i32_47 : i32
    %172 = arith.index_cast %171 : i32 to index
    %c0_48 = arith.constant 0 : index
    %173 = vector.load %arg11[%172, %c0_48] : memref<16x128xf32, #tpu.memory_space<vmem>>, vector<2x128xf32>
    %cst_49 = arith.constant dense<0.000000e+00> : vector<2x128xf32>
    %174 = tpu.matmul %170, %12, %cst_49 {dimension_numbers = #tpu.dot_dimension_numbers<[1], [0], [0], [1], [0, 0, 1, 1], [], []>} : vector<2x32xf32>, vector<32x128xf32>, vector<2x128xf32> -> vector<2x128xf32>
    %175 = vector.broadcast %13 : vector<1x128xf32> to vector<2x128xf32>
    %176 = arith.addf %174, %175 : vector<2x128xf32>
    %177 = vector.extract_strided_slice %173 {offsets = [0, 0], sizes = [2, 64], strides = [1, 1]} : vector<2x128xf32> to vector<2x64xf32>
    %178 = vector.extract_strided_slice %176 {offsets = [0, 0], sizes = [2, 64], strides = [1, 1]} : vector<2x128xf32> to vector<2x64xf32>
    %179 = arith.addf %177, %178 : vector<2x64xf32>
    %180 = arith.negf %179 : vector<2x64xf32>
    %181 = math.exp %180 : vector<2x64xf32>
    %cst_50 = arith.constant 1.000000e+00 : f32
    %182 = vector.broadcast %cst_50 : f32 to vector<2x64xf32>
    %183 = arith.addf %182, %181 : vector<2x64xf32>
    %184 = arith.divf %182, %183 : vector<2x64xf32>
    %185 = vector.extract_strided_slice %184 {offsets = [0, 0], sizes = [2, 32], strides = [1, 1]} : vector<2x64xf32> to vector<2x32xf32>
    %186 = vector.extract_strided_slice %184 {offsets = [0, 32], sizes = [2, 32], strides = [1, 1]} : vector<2x64xf32> to vector<2x32xf32>
    %187 = vector.extract_strided_slice %173 {offsets = [0, 64], sizes = [2, 32], strides = [1, 1]} : vector<2x128xf32> to vector<2x32xf32>
    %188 = vector.extract_strided_slice %176 {offsets = [0, 64], sizes = [2, 32], strides = [1, 1]} : vector<2x128xf32> to vector<2x32xf32>
    %189 = arith.mulf %185, %188 : vector<2x32xf32>
    %190 = arith.addf %187, %189 : vector<2x32xf32>
    %191 = math.tanh %190 : vector<2x32xf32>
    %cst_51 = arith.constant 1.000000e+00 : f32
    %192 = vector.broadcast %cst_51 : f32 to vector<2x32xf32>
    %193 = arith.subf %192, %186 : vector<2x32xf32>
    %194 = arith.mulf %193, %191 : vector<2x32xf32>
    %195 = arith.mulf %186, %170 : vector<2x32xf32>
    %196 = arith.addf %194, %195 : vector<2x32xf32>
    %c7_i32 = arith.constant 7 : i32
    %c2_i32_52 = arith.constant 2 : i32
    %197 = arith.muli %c7_i32, %c2_i32_52 : i32
    %198 = arith.index_cast %197 : i32 to index
    %c0_53 = arith.constant 0 : index
    %199 = vector.load %arg11[%198, %c0_53] : memref<16x128xf32, #tpu.memory_space<vmem>>, vector<2x128xf32>
    %cst_54 = arith.constant dense<0.000000e+00> : vector<2x128xf32>
    %200 = tpu.matmul %196, %12, %cst_54 {dimension_numbers = #tpu.dot_dimension_numbers<[1], [0], [0], [1], [0, 0, 1, 1], [], []>} : vector<2x32xf32>, vector<32x128xf32>, vector<2x128xf32> -> vector<2x128xf32>
    %201 = vector.broadcast %13 : vector<1x128xf32> to vector<2x128xf32>
    %202 = arith.addf %200, %201 : vector<2x128xf32>
    %203 = vector.extract_strided_slice %199 {offsets = [0, 0], sizes = [2, 64], strides = [1, 1]} : vector<2x128xf32> to vector<2x64xf32>
    %204 = vector.extract_strided_slice %202 {offsets = [0, 0], sizes = [2, 64], strides = [1, 1]} : vector<2x128xf32> to vector<2x64xf32>
    %205 = arith.addf %203, %204 : vector<2x64xf32>
    %206 = arith.negf %205 : vector<2x64xf32>
    %207 = math.exp %206 : vector<2x64xf32>
    %cst_55 = arith.constant 1.000000e+00 : f32
    %208 = vector.broadcast %cst_55 : f32 to vector<2x64xf32>
    %209 = arith.addf %208, %207 : vector<2x64xf32>
    %210 = arith.divf %208, %209 : vector<2x64xf32>
    %211 = vector.extract_strided_slice %210 {offsets = [0, 0], sizes = [2, 32], strides = [1, 1]} : vector<2x64xf32> to vector<2x32xf32>
    %212 = vector.extract_strided_slice %210 {offsets = [0, 32], sizes = [2, 32], strides = [1, 1]} : vector<2x64xf32> to vector<2x32xf32>
    %213 = vector.extract_strided_slice %199 {offsets = [0, 64], sizes = [2, 32], strides = [1, 1]} : vector<2x128xf32> to vector<2x32xf32>
    %214 = vector.extract_strided_slice %202 {offsets = [0, 64], sizes = [2, 32], strides = [1, 1]} : vector<2x128xf32> to vector<2x32xf32>
    %215 = arith.mulf %211, %214 : vector<2x32xf32>
    %216 = arith.addf %213, %215 : vector<2x32xf32>
    %217 = math.tanh %216 : vector<2x32xf32>
    %cst_56 = arith.constant 1.000000e+00 : f32
    %218 = vector.broadcast %cst_56 : f32 to vector<2x32xf32>
    %219 = arith.subf %218, %212 : vector<2x32xf32>
    %220 = arith.mulf %219, %217 : vector<2x32xf32>
    %221 = arith.mulf %212, %196 : vector<2x32xf32>
    %222 = arith.addf %220, %221 : vector<2x32xf32>
    %c8_i32 = arith.constant 8 : i32
    %c0_57 = arith.constant 0 : index
    %c0_58 = arith.constant 0 : index
    %223 = vector.load %arg8[%c0_57, %c0_58] : memref<32x128xf32, #tpu.memory_space<vmem>>, vector<32x128xf32>
    %cst_59 = arith.constant dense<0.000000e+00> : vector<2x128xf32>
    %224 = tpu.matmul %222, %223, %cst_59 {dimension_numbers = #tpu.dot_dimension_numbers<[1], [0], [0], [1], [0, 0, 1, 1], [], []>} : vector<2x32xf32>, vector<32x128xf32>, vector<2x128xf32> -> vector<2x128xf32>
    %c0_60 = arith.constant 0 : index
    %c0_61 = arith.constant 0 : index
    %225 = vector.load %arg9[%c0_60, %c0_61] : memref<1x128xf32, #tpu.memory_space<vmem>>, vector<1x128xf32>
    %226 = vector.broadcast %225 : vector<1x128xf32> to vector<2x128xf32>
    %227 = arith.addf %224, %226 : vector<2x128xf32>
    %c0_62 = arith.constant 0 : index
    %c0_63 = arith.constant 0 : index
    %228 = vector.load %arg10[%c0_62, %c0_63] : memref<2x128xf32, #tpu.memory_space<vmem>>, vector<2x128xf32>
    tpu.vector_store %arg10[%c0_62, %c0_63], %227 {strides = array<i32>} : memref<2x128xf32, #tpu.memory_space<vmem>>, vector<2x128xf32>,
    return
  }
  func.func @transform_0(%arg0: i32) -> (i32, i32) {
    %c0_i32 = arith.constant 0 : i32
    %c0_i32_0 = arith.constant 0 : i32
    %c0_i32_1 = arith.constant 0 : i32
    return %c0_i32, %c0_i32_0 : i32, i32
  }
  func.func @transform_1(%arg0: i32) -> (i32, i32) {
    %c0_i32 = arith.constant 0 : i32
    %c0_i32_0 = arith.constant 0 : i32
    %c0_i32_1 = arith.constant 0 : i32
    return %c0_i32, %c0_i32_0 : i32, i32
  }
  func.func @transform_2(%arg0: i32) -> (i32, i32) {
    %c0_i32 = arith.constant 0 : i32
    %c0_i32_0 = arith.constant 0 : i32
    %c0_i32_1 = arith.constant 0 : i32
    return %c0_i32, %c0_i32_0 : i32, i32
  }
  func.func @transform_3(%arg0: i32) -> (i32, i32) {
    %c0_i32 = arith.constant 0 : i32
    %c0_i32_0 = arith.constant 0 : i32
    %c0_i32_1 = arith.constant 0 : i32
    return %c0_i32, %c0_i32_0 : i32, i32
  }
  func.func @transform_4(%arg0: i32) -> (i32, i32) {
    %c0_i32 = arith.constant 0 : i32
    %c0_i32_0 = arith.constant 0 : i32
    %c0_i32_1 = arith.constant 0 : i32
    return %c0_i32, %c0_i32_0 : i32, i32
  }
  func.func @transform_5(%arg0: i32) -> (i32, i32) {
    %c0_i32 = arith.constant 0 : i32
    %c0_i32_0 = arith.constant 0 : i32
    %c0_i32_1 = arith.constant 0 : i32
    return %c0_i32, %c0_i32_0 : i32, i32
  }
  func.func @transform_6(%arg0: i32) -> (i32, i32) {
    %c0_i32 = arith.constant 0 : i32
    %c0_i32_0 = arith.constant 0 : i32
    %c0_i32_1 = arith.constant 0 : i32
    return %c0_i32, %c0_i32_0 : i32, i32
  }
  func.func @transform_7(%arg0: i32) -> (i32, i32) {
    %c0_i32 = arith.constant 0 : i32
    %c0_i32_0 = arith.constant 0 : i32
    %c0_i32_1 = arith.constant 0 : i32
    return %c0_i32, %c0_i32_0 : i32, i32
  }
  func.func @transform_8(%arg0: i32) -> (i32, i32) {
    %c0_i32 = arith.constant 0 : i32
    %c0_i32_0 = arith.constant 0 : i32
    %c0_i32_1 = arith.constant 0 : i32
    return %c0_i32, %c0_i32_0 : i32, i32
  }
  func.func @transform_9(%arg0: i32) -> (i32, i32) {
    %c0_i32 = arith.constant 0 : i32
    %c0_i32_0 = arith.constant 0 : i32
    %c0_i32_1 = arith.constant 0 : i32
    return %c0_i32, %c0_i32_0 : i32, i32
  }
}

</mosaic_0001>

<bundles_post_ra>
// kernel: gru_classifier_forward.1
= control target key start
LH: loop header
LB: loop body
LE: loop exit
PB: predicated region body
PF: predicated region fallthrough
CT: control target
= control target key end

     0   :  { %s2800_s0 = inlined_call_operand.vmem [shape: f32[16,1024], index: 0, kind: input, shape index: {}]   ;;  %s2801_s1 = inlined_call_operand.vmem [shape: f32[1024,64], index: 1, kind: input, shape index: {}]   ;;  %s2802_s2 = inlined_call_operand.vmem [shape: f32[1,64], index: 2, kind: input, shape index: {}]   ;;  %s2803_s3 = inlined_call_operand.vmem [shape: f32[64,128], index: 3, kind: input, shape index: {}]   ;;  %s2804_s4 = inlined_call_operand.vmem [shape: f32[1,128], index: 4, kind: input, shape index: {}]   ;;  %s2805_s5 = inlined_call_operand.vmem [shape: f32[32,128], index: 5, kind: input, shape index: {}]   ;;  %s2806_s6 = inlined_call_operand.vmem [shape: f32[1,128], index: 6, kind: input, shape index: {}]   ;;  %s2807_s7 = inlined_call_operand.vmem [shape: f32[32,128], index: 7, kind: input, shape index: {}]   ;;  %s2808_s8 = inlined_call_operand.vmem [shape: f32[1,128], index: 8, kind: input, shape index: {}]   ;;  %s2809_s9 = inlined_call_operand.hbm [shape: f32[2,128], index: 9, kind: output, shape index: {}]  }
   0x1   :  { %v65_v0 = vld [vmem:[%s2801_s1 + $0x80] sm:$0xff]  ;;  %v66_v1 = vld [vmem:[%s2801_s1 + $0x88] sm:$0xff]  ;;  %v67_v11 = vld [vmem:[%s2801_s1 + $0x90] sm:$0xff] }
   0x2   :  { %v49_v2 = vld [vmem:[%s2801_s1] sm:$0xff]  ;;  %v1857_v3 = vpack.c.bf16 %v66_v1, %v65_v0  ;;  %v50_v4 = vld [vmem:[%s2801_s1 + $0x8] sm:$0xff]  ;;  %v68_v13 = vld [vmem:[%s2801_s1 + $0x98] sm:$0xff] }
   0x3   :  { %v97_v5 = vld [vmem:[%s2801_s1 + $0x180] sm:$0xff]  ;;  %v98_v6 = vld [vmem:[%s2801_s1 + $0x188] sm:$0xff]  ;;  %v1859_v7 = vpack.c.bf16 %v50_v4, %v49_v2  ;;  %v51_v14 = vld [vmem:[%s2801_s1 + $0x10] sm:$0xff]  ;;  %v1861_v16 = vpack.c.bf16 %v68_v13, %v67_v11 }
   0x4   :  { %v1889_v8 = vpack.c.bf16 %v98_v6, %v97_v5  ;;  %v81_v9 = vld [vmem:[%s2801_s1 + $0x100] sm:$0xff]  ;;  %v82_v10 = vld [vmem:[%s2801_s1 + $0x108] sm:$0xff]  ;;  %1858 = vmatprep.subr.bf16.mxu0 %v1857_v3  ;;  %v52_v15 = vld [vmem:[%s2801_s1 + $0x18] sm:$0xff] }
   0x5   :  { %v1891_v12 = vpack.c.bf16 %v82_v10, %v81_v9  ;;  %1860 = vmatpush3.bf16.msra.mxu0 %v1859_v7  ;;  %v1863_v17 = vpack.c.bf16 %v52_v15, %v51_v14  ;;  %v99_v18 = vld [vmem:[%s2801_s1 + $0x190] sm:$0xff]  ;;  %v100_v19 = vld [vmem:[%s2801_s1 + $0x198] sm:$0xff]  ;;  %v69_v23 = vld [vmem:[%s2801_s1 + $0xa0] sm:$0xff] }
   0x6   :  { %1890 = vmatprep.subr.bf16.mxu1 %v1889_v8  ;;  %v83_v20 = vld [vmem:[%s2801_s1 + $0x110] sm:$0xff]  ;;  %v1893_v21 = vpack.c.bf16 %v100_v19, %v99_v18  ;;  %v84_v22 = vld [vmem:[%s2801_s1 + $0x118] sm:$0xff]  ;;  %v70_v24 = vld [vmem:[%s2801_s1 + $0xa8] sm:$0xff]  ;;  %1862 = vmatprep.subr.bf16.mxu0 %v1861_v16 }
   0x7   :  { %1892 = vmatpush3.bf16.msra.mxu1 %v1891_v12  ;;  %v1895_v25 = vpack.c.bf16 %v84_v22, %v83_v20  ;;  %v1865_v26 = vpack.c.bf16 %v70_v24, %v69_v23  ;;  %v53_v27 = vld [vmem:[%s2801_s1 + $0x20] sm:$0xff]  ;;  %v54_v28 = vld [vmem:[%s2801_s1 + $0x28] sm:$0xff]  ;;  %v71_v35 = vld [vmem:[%s2801_s1 + $0xb0] sm:$0xff] }
   0x8   :  { %v101_v29 = vld [vmem:[%s2801_s1 + $0x1a0] sm:$0xff]  ;;  %1894 = vmatprep.subr.bf16.mxu1 %v1893_v21  ;;  %v102_v30 = vld [vmem:[%s2801_s1 + $0x1a8] sm:$0xff]  ;;  %v1867_v33 = vpack.c.bf16 %v54_v28, %v53_v27  ;;  %v72_v36 = vld [vmem:[%s2801_s1 + $0xb8] sm:$0xff] }
   0x9   :  { %v85_v31 = vld [vmem:[%s2801_s1 + $0x120] sm:$0xff]  ;;  %v86_v32 = vld [vmem:[%s2801_s1 + $0x128] sm:$0xff]  ;;  %1864 = vmatpush3.bf16.msra.mxu0 %v1863_v17  ;;  %v1897_v34 = vpack.c.bf16 %v102_v30, %v101_v29  ;;  %v55_v37 = vld [vmem:[%s2801_s1 + $0x30] sm:$0xff]  ;;  %v1869_v39 = vpack.c.bf16 %v72_v36, %v71_v35 }
   0xa   :  { %1866 = vmatprep.subr.bf16.mxu0 %v1865_v26  ;;  %v1899_v38 = vpack.c.bf16 %v86_v32, %v85_v31  ;;  %v56_v40 = vld [vmem:[%s2801_s1 + $0x38] sm:$0xff]  ;;  %v103_v41 = vld [vmem:[%s2801_s1 + $0x1b0] sm:$0xff]  ;;  %v73_v46 = vld [vmem:[%s2801_s1 + $0xc0] sm:$0xff] }
   0xb   :  { %1896 = vmatpush3.bf16.msra.mxu1 %v1895_v25  ;;  %v104_v42 = vld [vmem:[%s2801_s1 + $0x1b8] sm:$0xff]  ;;  %v87_v44 = vld [vmem:[%s2801_s1 + $0x130] sm:$0xff]  ;;  %v74_v47 = vld [vmem:[%s2801_s1 + $0xc8] sm:$0xff]  ;;  %v1871_v48 = vpack.c.bf16 %v56_v40, %v55_v37 }
   0xc   :  { %1898 = vmatprep.subr.bf16.mxu1 %v1897_v34  ;;  %v1901_v43 = vpack.c.bf16 %v104_v42, %v103_v41  ;;  %v88_v45 = vld [vmem:[%s2801_s1 + $0x138] sm:$0xff]  ;;  %v105_v49 = vld [vmem:[%s2801_s1 + $0x1c0] sm:$0xff]  ;;  %v106_v50 = vld [vmem:[%s2801_s1 + $0x1c8] sm:$0xff]  ;;  %v1873_v52 = vpack.c.bf16 %v74_v47, %v73_v46 }
   0xd   :  { %1868 = vmatpush3.bf16.msra.mxu0 %v1867_v33  ;;  %v1903_v51 = vpack.c.bf16 %v88_v45, %v87_v44  ;;  %v57_v53 = vld [vmem:[%s2801_s1 + $0x40] sm:$0xff]  ;;  %v58_v54 = vld [vmem:[%s2801_s1 + $0x48] sm:$0xff]  ;;  %v1905_v56 = vpack.c.bf16 %v106_v50, %v105_v49  ;;  %v75_v58 = vld [vmem:[%s2801_s1 + $0xd0] sm:$0xff] }
   0xe   :  { %1870 = vmatprep.subr.bf16.mxu0 %v1869_v39  ;;  %v89_v55 = vld [vmem:[%s2801_s1 + $0x140] sm:$0xff]  ;;  %v90_v57 = vld [vmem:[%s2801_s1 + $0x148] sm:$0xff]  ;;  %v76_v59 = vld [vmem:[%s2801_s1 + $0xd8] sm:$0xff]  ;;  %v1875_v62 = vpack.c.bf16 %v58_v54, %v57_v53 }
   0xf   :  { %1900 = vmatpush3.bf16.msra.mxu1 %v1899_v38  ;;  %v107_v60 = vld [vmem:[%s2801_s1 + $0x1d0] sm:$0xff]  ;;  %v108_v61 = vld [vmem:[%s2801_s1 + $0x1d8] sm:$0xff]  ;;  %v1907_v63 = vpack.c.bf16 %v90_v57, %v89_v55  ;;  %v1877_v0 = vpack.c.bf16 %v76_v59, %v75_v58  ;;  %v77_v6 = vld [vmem:[%s2801_s1 + $0xe0] sm:$0xff] }
  0x10   :  { %1902 = vmatprep.subr.bf16.mxu1 %v1901_v43  ;;  %v59_v1 = vld [vmem:[%s2801_s1 + $0x50] sm:$0xff]  ;;  %v60_v2 = vld [vmem:[%s2801_s1 + $0x58] sm:$0xff]  ;;  %v1909_v4 = vpack.c.bf16 %v108_v61, %v107_v60  ;;  %v78_v7 = vld [vmem:[%s2801_s1 + $0xe8] sm:$0xff] }
  0x11   :  { %1872 = vmatpush3.bf16.msra.mxu0 %v1871_v48  ;;  %v91_v3 = vld [vmem:[%s2801_s1 + $0x150] sm:$0xff]  ;;  %v92_v5 = vld [vmem:[%s2801_s1 + $0x158] sm:$0xff]  ;;  %v109_v8 = vld [vmem:[%s2801_s1 + $0x1e0] sm:$0xff]  ;;  %v1879_v10 = vpack.c.bf16 %v60_v2, %v59_v1  ;;  %v1881_v14 = vpack.c.bf16 %v78_v7, %v77_v6 }
  0x12   :  { %1874 = vmatprep.subr.bf16.mxu0 %v1873_v52  ;;  %v110_v9 = vld [vmem:[%s2801_s1 + $0x1e8] sm:$0xff]  ;;  %v61_v11 = vld [vmem:[%s2801_s1 + $0x60] sm:$0xff]  ;;  %v1911_v13 = vpack.c.bf16 %v92_v5, %v91_v3  ;;  %v79_v19 = vld [vmem:[%s2801_s1 + $0xf0] sm:$0xff] }
  0x13   :  { %1904 = vmatpush3.bf16.msra.mxu1 %v1903_v51  ;;  %v62_v12 = vld [vmem:[%s2801_s1 + $0x68] sm:$0xff]  ;;  %v93_v15 = vld [vmem:[%s2801_s1 + $0x160] sm:$0xff]  ;;  %v1913_v18 = vpack.c.bf16 %v110_v9, %v109_v8  ;;  %v80_v20 = vld [vmem:[%s2801_s1 + $0xf8] sm:$0xff] }
  0x14   :  { %1906 = vmatprep.subr.bf16.mxu1 %v1905_v56  ;;  %v94_v16 = vld [vmem:[%s2801_s1 + $0x168] sm:$0xff]  ;;  %v36_v21 = vld [vmem:[%s2800_s0 + $0x18] sm:$0xff]  ;;  %v111_v22 = vld [vmem:[%s2801_s1 + $0x1f0] sm:$0xff]  ;;  %v1883_v24 = vpack.c.bf16 %v62_v12, %v61_v11  ;;  %v1885_v26 = vpack.c.bf16 %v80_v20, %v79_v19 }
  0x15   :  { %1876 = vmatpush3.bf16.msra.mxu0 %v1875_v62  ;;  %v34_v17 = vld [vmem:[%s2800_s0 + $0x8] sm:$0xff]  ;;  %v112_v23 = vld [vmem:[%s2801_s1 + $0x1f8] sm:$0xff]  ;;  %323 = vmatprep.mubr.f32.mxu1 %v36_v21  ;;  %v1915_v25 = vpack.c.bf16 %v94_v16, %v93_v15  ;;  %v63_v27 = vld [vmem:[%s2801_s1 + $0x70] sm:$0xff] }
  0x16   :  { %1878 = vmatprep.subr.bf16.mxu0 %v1877_v0  ;;  %248 = vmatprep.mubr.f32.mxu0 %v34_v17  ;;  %v64_v28 = vld [vmem:[%s2801_s1 + $0x78] sm:$0xff]  ;;  %v95_v29 = vld [vmem:[%s2801_s1 + $0x170] sm:$0xff]  ;;  %v1917_v30 = vpack.c.bf16 %v112_v23, %v111_v22  ;;  %v129_v32 = vld [vmem:[%s2801_s1 + $0x280] sm:$0xff] }
  0x17   :  { %1908 = vmatpush3.bf16.msra.mxu1 %v1907_v63  ;;  %v96_v31 = vld [vmem:[%s2801_s1 + $0x178] sm:$0xff]  ;;  %v130_v33 = vld [vmem:[%s2801_s1 + $0x288] sm:$0xff]  ;;  %v161_v34 = vld [vmem:[%s2801_s1 + $0x380] sm:$0xff]  ;;  %v1887_v36 = vpack.c.bf16 %v64_v28, %v63_v27 }
  0x18   :  { %1910 = vmatprep.subr.bf16.mxu1 %v1909_v4  ;;  %v162_v35 = vld [vmem:[%s2801_s1 + $0x388] sm:$0xff]  ;;  %v1919_v37 = vpack.c.bf16 %v96_v31, %v95_v29  ;;  %v1921_v38 = vpack.c.bf16 %v130_v33, %v129_v32  ;;  %v113_v39 = vld [vmem:[%s2801_s1 + $0x200] sm:$0xff]  ;;  %v131_v44 = vld [vmem:[%s2801_s1 + $0x290] sm:$0xff] }
  0x19   :  { %1880 = vmatpush3.bf16.msra.mxu0 %v1879_v10  ;;  %v114_v40 = vld [vmem:[%s2801_s1 + $0x208] sm:$0xff]  ;;  %v145_v41 = vld [vmem:[%s2801_s1 + $0x300] sm:$0xff]  ;;  %v1953_v42 = vpack.c.bf16 %v162_v35, %v161_v34  ;;  %v132_v45 = vld [vmem:[%s2801_s1 + $0x298] sm:$0xff] }
  0x1a   :  { %1882 = vmatprep.subr.bf16.mxu0 %v1881_v14  ;;  %v146_v43 = vld [vmem:[%s2801_s1 + $0x308] sm:$0xff]  ;;  %v163_v46 = vld [vmem:[%s2801_s1 + $0x390] sm:$0xff]  ;;  %v164_v47 = vld [vmem:[%s2801_s1 + $0x398] sm:$0xff]  ;;  %v1923_v49 = vpack.c.bf16 %v114_v40, %v113_v39  ;;  %v1925_v52 = vpack.c.bf16 %v132_v45, %v131_v44 }
  0x1b   :  { %1912 = vmatpush3.bf16.msra.mxu1 %v1911_v13  ;;  %v33_v48 = vld [vmem:[%s2800_s0] sm:$0xff]  ;;  %v35_v50 = vld [vmem:[%s2800_s0 + $0x10] sm:$0xff]  ;;  %v1955_v51 = vpack.c.bf16 %v146_v43, %v145_v41  ;;  %v116_v54 = vld [vmem:[%s2801_s1 + $0x218] sm:$0xff]  ;;  %v1957_v56 = vpack.c.bf16 %v164_v47, %v163_v46 }
  0x1c   :  { %1914 = vmatprep.subr.bf16.mxu1 %v1913_v18  ;;  %v115_v53 = vld [vmem:[%s2801_s1 + $0x210] sm:$0xff]  ;;  %v148_v57 = vld [vmem:[%s2801_s1 + $0x318] sm:$0xff]  ;;  %v133_v58 = vld [vmem:[%s2801_s1 + $0x2a0] sm:$0xff] }
  0x1d   :  { %1884 = vmatpush3.bf16.msra.mxu0 %v1883_v24  ;;  %v147_v55 = vld [vmem:[%s2801_s1 + $0x310] sm:$0xff]  ;;  %v134_v59 = vld [vmem:[%s2801_s1 + $0x2a8] sm:$0xff]  ;;  %v165_v60 = vld [vmem:[%s2801_s1 + $0x3a0] sm:$0xff]  ;;  %v1927_v62 = vpack.c.bf16 %v116_v54, %v115_v53 }
  0x1e   :  { %1886 = vmatprep.subr.bf16.mxu0 %v1885_v26  ;;  %v166_v61 = vld [vmem:[%s2801_s1 + $0x3a8] sm:$0xff]  ;;  %v1959_v63 = vpack.c.bf16 %v148_v57, %v147_v55  ;;  %v1929_v0 = vpack.c.bf16 %v134_v59, %v133_v58  ;;  %v117_v1 = vld [vmem:[%s2801_s1 + $0x220] sm:$0xff]  ;;  %v135_v6 = vld [vmem:[%s2801_s1 + $0x2b0] sm:$0xff] }
  0x1f   :  { %1916 = vmatpush3.bf16.msra.mxu1 %v1915_v25  ;;  %v118_v2 = vld [vmem:[%s2801_s1 + $0x228] sm:$0xff]  ;;  %v149_v3 = vld [vmem:[%s2801_s1 + $0x320] sm:$0xff]  ;;  %v1961_v4 = vpack.c.bf16 %v166_v61, %v165_v60  ;;  %v136_v7 = vld [vmem:[%s2801_s1 + $0x2b8] sm:$0xff] }
  0x20   :  { %1918 = vmatprep.subr.bf16.mxu1 %v1917_v30  ;;  %v150_v5 = vld [vmem:[%s2801_s1 + $0x328] sm:$0xff]  ;;  %v167_v8 = vld [vmem:[%s2801_s1 + $0x3b0] sm:$0xff]  ;;  %v168_v9 = vld [vmem:[%s2801_s1 + $0x3b8] sm:$0xff]  ;;  %v1931_v10 = vpack.c.bf16 %v118_v2, %v117_v1  ;;  %v1933_v15 = vpack.c.bf16 %v136_v7, %v135_v6 }
  0x21   :  { %1888 = vmatpush3.bf16.msra.mxu0 %v1887_v36  ;;  %v119_v11 = vld [vmem:[%s2801_s1 + $0x230] sm:$0xff]  ;;  %v120_v12 = vld [vmem:[%s2801_s1 + $0x238] sm:$0xff]  ;;  %v42_v13 = vld [vmem:[%s2800_s0 + $0x48] sm:$0xff]  ;;  %v1963_v14 = vpack.c.bf16 %v150_v5, %v149_v3  ;;  %v1965_v19 = vpack.c.bf16 %v168_v9, %v167_v8 }
  0x22   :  { %1922 = vmatprep.subr.bf16.mxu0 %v1921_v38  ;;  %v151_v16 = vld [vmem:[%s2801_s1 + $0x330] sm:$0xff]  ;;  %v152_v17 = vld [vmem:[%s2801_s1 + $0x338] sm:$0xff]  ;;  %v41_v18 = vld [vmem:[%s2800_s0 + $0x40] sm:$0xff]  ;;  %v1935_v26 = vpack.c.bf16 %v120_v12, %v119_v11 }
  0x23   :  { %1920 = vmatpush3.bf16.msra.mxu1 %v1919_v37  ;;  %v137_v20 = vld [vmem:[%s2801_s1 + $0x2c0] sm:$0xff]  ;;  %v138_v21 = vld [vmem:[%s2801_s1 + $0x2c8] sm:$0xff]  ;;  %v44_v22 = vld [vmem:[%s2800_s0 + $0x58] sm:$0xff]  ;;  %v1967_v29 = vpack.c.bf16 %v152_v17, %v151_v16 }
  0x24   :  { %1954 = vmatprep.subr.bf16.mxu1 %v1953_v42  ;;  %249 = vmatmul.mubr.f32.vlgmr.msra.gmra.mrb[0].mxu0 %v33_v48  ;;  %v169_v23 = vld [vmem:[%s2801_s1 + $0x3c0] sm:$0xff]  ;;  %v170_v24 = vld [vmem:[%s2801_s1 + $0x3c8] sm:$0xff]  ;;  %v43_v25 = vld [vmem:[%s2800_s0 + $0x50] sm:$0xff]  ;;  %v1937_v30 = vpack.c.bf16 %v138_v21, %v137_v20 }
  0x25   :  { %1924 = vmatpush3.bf16.msra.mxu0 %v1923_v49  ;;  %253 = vmatprep.mubr.f32.mxu0 %v42_v13  ;;  %v121_v27 = vld [vmem:[%s2801_s1 + $0x240] sm:$0xff]  ;;  %v122_v28 = vld [vmem:[%s2801_s1 + $0x248] sm:$0xff]  ;;  %v1969_v34 = vpack.c.bf16 %v170_v24, %v169_v23  ;;  %v139_v35 = vld [vmem:[%s2801_s1 + $0x2d0] sm:$0xff] }
  0x26   :  { %324 = vmatmul.mubr.f32.vlgmr.msra.gmra.mrb[0].mxu1 %v35_v50  ;;  %1926 = vmatprep.subr.bf16.mxu0 %v1925_v52  ;;  %v153_v31 = vld [vmem:[%s2801_s1 + $0x340] sm:$0xff]  ;;  %v154_v32 = vld [vmem:[%s2801_s1 + $0x348] sm:$0xff]  ;;  %v140_v36 = vld [vmem:[%s2801_s1 + $0x2d8] sm:$0xff]  ;;  %v1939_v40 = vpack.c.bf16 %v122_v28, %v121_v27 }
  0x27   :  { %1956 = vmatpush3.bf16.msra.mxu1 %v1955_v51  ;;  %328 = vmatprep.mubr.f32.mxu1 %v44_v22  ;;  %v38_v33 = vld [vmem:[%s2800_s0 + $0x28] sm:$0xff]  ;;  %v40_v37 = vld [vmem:[%s2800_s0 + $0x38] sm:$0xff]  ;;  %v171_v38 = vld [vmem:[%s2801_s1 + $0x3d0] sm:$0xff]  ;;  %v1971_v42 = vpack.c.bf16 %v154_v32, %v153_v31  ;;  %v1941_v43 = vpack.c.bf16 %v140_v36, %v139_v35 }
  0x28   :  { %1958 = vmatprep.subr.bf16.mxu1 %v1957_v56  ;;  %254 = vmatmul.mubr.f32.gmra.mrb[2].mxu0 %v41_v18  ;;  %v172_v39 = vld [vmem:[%s2801_s1 + $0x3d8] sm:$0xff]  ;;  %v123_v41 = vld [vmem:[%s2801_s1 + $0x250] sm:$0xff] }
  0x29   :  { %1928 = vmatpush3.bf16.msra.mxu0 %v1927_v62  ;;  %398 = vmatprep.mubr.f32.mxu0 %v38_v33  ;;  %v124_v44 = vld [vmem:[%s2801_s1 + $0x258] sm:$0xff]  ;;  %v155_v45 = vld [vmem:[%s2801_s1 + $0x350] sm:$0xff] }
  0x2a   :  { %1930 = vmatprep.subr.bf16.mxu0 %v1929_v0  ;;  %329 = vmatmul.mubr.f32.gmra.mrb[2].mxu1 %v43_v25 }
  0x2b   :  { %1960 = vmatpush3.bf16.msra.mxu1 %v1959_v63  ;;  %473 = vmatprep.mubr.f32.mxu1 %v40_v37 }
  0x2c   :  { %1962 = vmatprep.subr.bf16.mxu1 %v1961_v4 }
  0x2d   :  { %1932 = vmatpush3.bf16.msra.mxu0 %v1931_v10 }
  0x2e   :  { %1934 = vmatprep.subr.bf16.mxu0 %v1933_v15 }
  0x2f   :  { %1964 = vmatpush3.bf16.msra.mxu1 %v1963_v14 }
  0x30   :  { %1966 = vmatprep.subr.bf16.mxu1 %v1965_v19 }
  0x31   :  { %1936 = vmatpush3.bf16.msra.mxu0 %v1935_v26 }
  0x32   :  { %1938 = vmatprep.subr.bf16.mxu0 %v1937_v30 }
  0x33   :  { %1968 = vmatpush3.bf16.msra.mxu1 %v1967_v29 }
  0x34   :  { %14 = vsyncpa [#allocation4], 0  ;;  %1970 = vmatprep.subr.bf16.mxu1 %v1969_v34  ;;  %v1973_v46 = vpack.c.bf16 %v172_v39, %v171_v38  ;;  %v156_v47 = vld [vmem:[%s2801_s1 + $0x358] sm:$0xff]  ;;  %v141_v48 = vld [vmem:[%s2801_s1 + $0x2e0] sm:$0xff]  ;;  %v1943_v52 = vpack.c.bf16 %v124_v44, %v123_v41  ;;  %v2133_v17 = vmov 0.0|0.0   ;;  %vm2134_vm0 = vmmov 0  }
  0x35   :  { %v142_v49 = vld [vmem:[%s2801_s1 + $0x2e8] sm:$0xff]  ;;  %v173_v50 = vld [vmem:[%s2801_s1 + $0x3e0] sm:$0xff]  ;;  %1940 = vmatpush3.bf16.msra.mxu0 %v1939_v40  ;;  %v1975_v53 = vpack.c.bf16 %v156_v47, %v155_v45  ;;  %v143_v60 = vld [vmem:[%s2801_s1 + $0x2f0] sm:$0xff]  ;;  %v2135_v23 = vmov 0.0   ;;  %vm499_vm1 = vcmask 523264   ;;  %s2136_s25 = smov 64  }
  0x36   :  { %v174_v51 = vld [vmem:[%s2801_s1 + $0x3e8] sm:$0xff]  ;;  %1942 = vmatprep.subr.bf16.mxu0 %v1941_v43  ;;  %v1945_v54 = vpack.c.bf16 %v142_v49, %v141_v48  ;;  %v125_v55 = vld [vmem:[%s2801_s1 + $0x260] sm:$0xff]  ;;  %v144_v61 = vld [vmem:[%s2801_s1 + $0x2f8] sm:$0xff]  ;;  %vm595_vm2 = vcmask 261120   ;;  %s2138_s13 = smov [#allocation3]  }
  0x37   :  { %1972 = vmatpush3.bf16.msra.mxu1 %v1971_v42  ;;  %v126_v56 = vld [vmem:[%s2801_s1 + $0x268] sm:$0xff]  ;;  %v157_v57 = vld [vmem:[%s2801_s1 + $0x360] sm:$0xff]  ;;  %v1977_v58 = vpack.c.bf16 %v174_v51, %v173_v50  ;;  %v175_v62 = vld [vmem:[%s2801_s1 + $0x3f0] sm:$0xff]  ;;  %v1949_v2 = vpack.c.bf16 %v144_v61, %v143_v60  ;;  %s1502_s14 = sshll.u32 %s2138_s13, 4  ;;  %s1503_s14 = int_to_ptr.vmem [resolvable:$true] %s1502_s14 }
  0x38   :  { %1974 = vmatprep.subr.bf16.mxu1 %v1973_v46  ;;  %v158_v59 = vld [vmem:[%s2801_s1 + $0x368] sm:$0xff]  ;;  %v176_v63 = vld [vmem:[%s2801_s1 + $0x3f8] sm:$0xff]  ;;  %v1947_v0 = vpack.c.bf16 %v126_v56, %v125_v55  ;;  %v127_v3 = vld [vmem:[%s2801_s1 + $0x270] sm:$0xff]  ;;  %s2109_s15 = scalar_lea.vmem %s1503_s14, 32  ;;  %p2114_p1 = scmp.lt.s32.totalorder %s1503_s14, %s1503_s14 }
  0x39   :  { %1944 = vmatpush3.bf16.msra.mxu0 %v1943_v52  ;;  %v1979_v1 = vpack.c.bf16 %v158_v59, %v157_v57  ;;  %v128_v4 = vld [vmem:[%s2801_s1 + $0x278] sm:$0xff]  ;;  %v1981_v5 = vpack.c.bf16 %v176_v63, %v175_v62  ;;  %v159_v6 = vld [vmem:[%s2801_s1 + $0x370] sm:$0xff]  ;;  %v583_v10 = vld [vmem:[%s2805_s5] sm:$0xff]  ;;  %p2110_p0 = scmp.ne.s32.totalorder %s1503_s14, %s2109_s15  ;;  %p2115_p2 = scmp.lt.s32.totalorder %s2109_s15, %s2109_s15 }
  0x3a   :  { %1946 = vmatprep.subr.bf16.mxu0 %v1945_v54  ;;  %v160_v7 = vld [vmem:[%s2801_s1 + $0x378] sm:$0xff]  ;;  %v1951_v8 = vpack.c.bf16 %v128_v4, %v127_v3  ;;  %v584_v11 = vld [vmem:[%s2805_s5 + $0x8] sm:$0xff]  ;;  %v37_v12 = vld [vmem:[%s2800_s0 + $0x20] sm:$0xff] }
  0x3b   :  { %1976 = vmatpush3.bf16.msra.mxu1 %v1975_v53  ;;  %v1983_v9 = vpack.c.bf16 %v160_v7, %v159_v6  ;;  %v39_v13 = vld [vmem:[%s2800_s0 + $0x30] sm:$0xff]  ;;  %v46_v14 = vld [vmem:[%s2800_s0 + $0x68] sm:$0xff]  ;;  %v2618_v15 = vpack.c.bf16 %v584_v11, %v583_v10  ;;  %v48_v16 = vld [vmem:[%s2800_s0 + $0x78] sm:$0xff]  ;;  %p2116_p3 = por %p2115_p2, %p2114_p1 }
  0x3c   :  { %1978 = vmatprep.subr.bf16.mxu1 %v1977_v58  ;;  %v585_v18 = vld [vmem:[%s2805_s5 + $0x10] sm:$0xff]  ;;  %v586_v19 = vld [vmem:[%s2805_s5 + $0x18] sm:$0xff]  ;;  %v45_v20 = vld [vmem:[%s2800_s0 + $0x60] sm:$0xff] }
  0x3d   :  { %1948 = vmatpush3.bf16.msra.mxu0 %v1947_v0  ;;  %v47_v21 = vld [vmem:[%s2800_s0 + $0x70] sm:$0xff]  ;;  %v2637_v22 = vpack.c.bf16 %v586_v19, %v585_v18  ;;  %v484_v24 = vld [vmem:[%s2803_s3] sm:$0xff]  ;;  %v485_v25 = vld [vmem:[%s2803_s3 + $0x8] sm:$0xff]  ;;  %p2117_p4 = pnand %p2116_p3, %p2110_p0 }
  0x3e   :  { %1950 = vmatprep.subr.bf16.mxu0 %v1949_v2  ;;  %v1985_v26 = vpack.c.bf16 %v485_v25, %v484_v24  ;;  %v486_v27 = vld [vmem:[%s2803_s3 + $0x10] sm:$0xff]  ;;  %v487_v28 = vld [vmem:[%s2803_s3 + $0x18] sm:$0xff]  ;;  %v488_v30 = vld [vmem:[%s2803_s3 + $0x20] sm:$0xff] }
  0x3f   :  { %1980 = vmatpush3.bf16.msra.mxu1 %v1979_v1  ;;  %v1989_v29 = vpack.c.bf16 %v487_v28, %v486_v27  ;;  %v489_v31 = vld [vmem:[%s2803_s3 + $0x28] sm:$0xff]  ;;  %v490_v33 = vld [vmem:[%s2803_s3 + $0x30] sm:$0xff]  ;;  %v491_v34 = vld [vmem:[%s2803_s3 + $0x38] sm:$0xff] }
  0x40   :  { %1982 = vmatprep.subr.bf16.mxu1 %v1981_v5  ;;  %v1993_v32 = vpack.c.bf16 %v489_v31, %v488_v30  ;;  %v1997_v35 = vpack.c.bf16 %v491_v34, %v490_v33  ;;  %v1510_v37 = vld [vmem:[%s2802_s2] ss:$0 sm:$0xff] }
  0x41   :  { %1952 = vmatpush3.bf16.msra.mxu0 %v1951_v8  ;;  %v2682_v3 = vld [vmem:[%s2806_s6] ss:$0 sm:$0xff] }
  0x42   :  { %1986 = vmatprep.subr.bf16.mxu0 %v1985_v26 }
  0x43   :  { %1984 = vmatpush3.bf16.msra.mxu1 %v1983_v9  ;;  %v1511_v9 = vld [vmem:[%s2804_s4] ss:$0 sm:$0xff]  ;;  %s2137_s4 = smov 96  }
  0x44   :  { %2001 = vmatprep.subr.bf16.mxu1 %v2133_v17  ;;  %399 = vmatmul.mubr.f32.vlgmr.msra.gmra.mrb[4].mxu0 %v37_v12 }
  0x45   :  { %403 = vmatprep.mubr.f32.mxu0 %v46_v14  ;;  %1988 = vmatpush3.bf16.msra.mxu0 %v1985_v26 }
  0x46   :  { %474 = vmatmul.mubr.f32.vlgmr.msra.gmra.mrb[4].mxu1 %v39_v13  ;;  %1990 = vmatprep.subr.bf16.mxu0 %v1989_v29 }
  0x47   :  { %478 = vmatprep.mubr.f32.mxu1 %v48_v16  ;;  %2003 = vmatpush3.bf16.msra.mxu1 %v2618_v15 }
  0x48   :  { %2004 = vmatprep.subr.bf16.mxu1 %v2133_v17  ;;  %404 = vmatmul.mubr.f32.gmra.mrb[6].mxu0 %v45_v20 }
  0x49   :  { %1992 = vmatpush3.bf16.msra.mxu0 %v1989_v29 }
  0x4a   :  { %479 = vmatmul.mubr.f32.gmra.mrb[6].mxu1 %v47_v21  ;;  %1994 = vmatprep.subr.bf16.mxu0 %v1993_v32 }
  0x4b   :  { %2006 = vmatpush3.bf16.msra.mxu1 %v2637_v22  ;;  %1766 = vmatprep.mubr.msk.f32.mxu1 %vm2134_vm0, %v2135_v23 }
  0x4c   :  { %2007 = vmatprep.subr.bf16.mxu1 %v2133_v17 }
  0x4d   :  { %1996 = vmatpush3.bf16.msra.mxu0 %v1993_v32 }
  0x4e   :  { %1767 = vmatmul.mubr.f32.vlgmr.msra.gmra.mrb[8].mxu1 %v2135_v23  ;;  %1998 = vmatprep.subr.bf16.mxu0 %v1997_v35 }
  0x4f   :  { %2009 = vmatpush3.bf16.msra.mxu1 %v2618_v15  ;;  %1777 = vmatprep.mubr.msk.f32.mxu1 %vm2134_vm0, %v2135_v23 }
  0x50   :  { %2010 = vmatprep.subr.bf16.mxu1 %v2133_v17 }
  0x51   :  { %2000 = vmatpush3.bf16.msra.mxu0 %v1997_v35 }
  0x52   :  { %2013 = vmatprep.subr.bf16.mxu0 %v2133_v17 }
  0x53   :  { %2012 = vmatpush3.bf16.msra.mxu1 %v2637_v22 }
  0x54   :  { %2019 = vmatprep.subr.bf16.mxu1 %v2133_v17 }
  0xf7   :  { %v1564_v36 = vpop.f32.mrb[0].mxu0 }
  0xf8   :  { %v1565_v38 = vpop.f32.mrb[1].mxu0 }
  0xf9   :  { %v1602_v39 = vpop.f32.mrb[0].mxu1  ;;  %v1566_v40 = vadd.f32 %v1565_v38, %v1564_v36 }
  0xfa   :  { %v1603_v41 = vpop.f32.mrb[1].mxu1 }
  0xfb   :  { %v1604_v42 = vadd.f32 %v1603_v41, %v1602_v39  ;;  %v251_v43 = vadd.f32 %v1566_v40, %v1510_v37  ;;  %v1567_v45 = vpop.f32.mrb[2].mxu0 }
  0xfc   :  { %v1568_v46 = vpop.f32.mrb[3].mxu0 }
  0xfd   :  { %v326_v44 = vadd.f32 %v1604_v42, %v251_v43  ;;  %v1605_v47 = vpop.f32.mrb[2].mxu1  ;;  %v1569_v48 = vadd.f32 %v1568_v46, %v1567_v45 }
  0xfe   :  { %v1606_v49 = vpop.f32.mrb[3].mxu1 }
  0xff   :  { %v1607_v50 = vadd.f32 %v1606_v49, %v1605_v47  ;;  %v256_v51 = vadd.f32 %v1569_v48, %v1510_v37 }
 0x101   :  { %v331_v52 = vadd.f32 %v1607_v50, %v256_v51 }
 0x117   :  { %v1640_v53 = vpop.f32.mrb[4].mxu0 }
 0x118   :  { %v1641_v54 = vpop.f32.mrb[5].mxu0 }
 0x119   :  { %v1678_v55 = vpop.f32.mrb[4].mxu1  ;;  %v1642_v56 = vadd.f32 %v1641_v54, %v1640_v53 }
 0x11a   :  { %v1679_v57 = vpop.f32.mrb[5].mxu1 }
 0x11b   :  { %v1680_v58 = vadd.f32 %v1679_v57, %v1678_v55  ;;  %v401_v59 = vadd.f32 %v1642_v56, %v326_v44  ;;  %v1643_v60 = vpop.f32.mrb[6].mxu0 }
 0x11c   :  { %v1644_v61 = vpop.f32.mrb[7].mxu0 }
 0x11d   :  { %v1681_v62 = vpop.f32.mrb[6].mxu1  ;;  %v476_v63 = vadd.f32 %v1680_v58, %v401_v59  ;;  %v1645_v0 = vadd.f32 %v1644_v61, %v1643_v60 }
 0x11e   :  { %v1682_v1 = vpop.f32.mrb[7].mxu1 }
 0x11f   :  { %v1683_v2 = vadd.f32 %v1682_v1, %v1681_v62  ;;  %v406_v4 = vadd.f32 %v1645_v0, %v331_v52  ;;  %1755 = vmatprep.mubr.msk.f32.mxu0 %vm499_vm1, %v476_v63 }
 0x121   :  { %v665_v5 = vpop.f32.mrb[8].mxu1  ;;  %v481_v6 = vadd.f32 %v1683_v2, %v406_v4 }
 0x122   :  { %v666_v7 = vadd.f32 %v2682_v3, %v665_v5  ;;  %v1768_v8 = vpop.f32.mrb[9].mxu1 }
 0x123   :  { %1756 = vmatmul.mubr.msk.f32.vlgmr.msra.gmra.mrb[8].mxu0 %vm499_vm1, %v481_v6 }
 0x124   :  { %677 = vrot.lane.b32.xlu0 %v666_v7, %s2136_s25  ;;  %2015 = vmatpush3.bf16.msra.mxu0 %v2618_v15 }
 0x125   :  { %1788 = vmatprep.mubr.msk.f32.mxu0 %vm2134_vm0, %v2135_v23  ;;  %2016 = vmatprep.subr.bf16.mxu0 %v2133_v17 }
 0x128   :  { %2018 = vmatpush3.bf16.msra.mxu0 %v2637_v22 }
 0x129   :  { %2025 = vmatprep.subr.bf16.mxu0 %v2133_v17 }
 0x196   :  { %v678_v21 = vpop.permute.xlu0 %677 }
 0x1f6   :  { %v1757_v10 = vpop.f32.mrb[8].mxu0 }
 0x1f7   :  { %v578_v11 = vadd.f32 %v1757_v10, %v1511_v9  ;;  %v572_v12 = vpop.f32.mrb[9].mxu0 }
 0x1f8   :  { %v573_v13 = vadd.f32 %v1511_v9, %v572_v12 }
 0x1f9   :  { %582 = vst [vmem:[#allocation2 + $0x8] sm:$0xff] %v578_v11 }
 0x1fa   :  { %581 = vst [vmem:[#allocation2] sm:$0xff] %v573_v13 }
 0x201   :  { %v588_v14 = vld [vmem:[#allocation2] sm:$0x3]  ;;  %v695_v38 = vld [vmem:[#allocation2 + $0x2] sm:$0x3]  ;;  %v797_v58 = vld [vmem:[#allocation2 + $0x4] sm:$0x3] }
 0x202   :  { %v669_v16 = vadd.f32 %v666_v7, %v588_v14 }
 0x204   :  { %v1515_v18 = vmul.f32 -1.442695, %v669_v16  ;;  %v899_v16 = vld [vmem:[#allocation2 + $0x6] sm:$0x3] }
 0x206   :  { %2061 = vpow2.f32 %v1515_v18 }
 0x210   :  { %v2062_v19 = vpop.eup %2061 }
 0x211   :  { %v673_v20 = vadd.f32 1.0, %v2062_v19 }
 0x213   :  { %2063 = vrcp.f32 %v673_v20 }
 0x21d   :  { %v2064_v24 = vpop.eup %2063 }
 0x21e   :  { %v680_v25 = vmul.f32 %v2064_v24, %v678_v21  ;;  %v687_v29 = vsub.f32 1.0, %v2064_v24  ;;  %v693_v31 = vmul.f32 0.0, %v2064_v24 }
 0x220   :  { %682 = vrot.lane.b32.xlu0 %v680_v25, %s2136_s25 }
 0x292   :  { %v683_v26 = vpop.permute.xlu0 %682 }
 0x293   :  { %v685_v27 = vadd.f32 %v683_v26, %v588_v14 }
 0x295   :  { %2065 = vtanh.f32 %v685_v27 }
 0x29f   :  { %v2066_v28 = vpop.eup %2065 }
 0x2a0   :  { %689 = vrot.lane.b32.xlu1 %v2066_v28, %s2137_s4 }
 0x312   :  { %v690_v30 = vpop.permute.xlu1 %689 }
 0x313   :  { %v692_v32 = vmul.f32 %v690_v30, %v687_v29 }
 0x315   :  { %v694_v33 = vadd.f32 %v693_v31, %v692_v32 }
 0x317   :  { %697 = vrot.lane.b32.xlu1 %v694_v33, %s2137_s4 }
 0x389   :  { %v698_v34 = vpop.permute.xlu1 %697 }
 0x38a   :  { %1778 = vmatmul.mubr.msk.f32.vlgmr.msra.gmra.mrb[10].mxu1 %vm595_vm2, %v698_v34 }
 0x38b   :  { %2021 = vmatpush3.bf16.msra.mxu1 %v2618_v15  ;;  %1799 = vmatprep.mubr.msk.f32.mxu1 %vm2134_vm0, %v2135_v23 }
 0x38c   :  { %2022 = vmatprep.subr.bf16.mxu1 %v2133_v17 }
 0x38f   :  { %2024 = vmatpush3.bf16.msra.mxu1 %v2637_v22 }
 0x390   :  { %2031 = vmatprep.subr.bf16.mxu1 %v2133_v17 }
 0x45d   :  { %v767_v35 = vpop.f32.mrb[10].mxu1 }
 0x45e   :  { %v768_v36 = vadd.f32 %v2682_v3, %v767_v35  ;;  %v1779_v37 = vpop.f32.mrb[11].mxu1 }
 0x460   :  { %779 = vrot.lane.b32.xlu0 %v768_v36, %s2136_s25  ;;  %v771_v39 = vadd.f32 %v768_v36, %v695_v38 }
 0x462   :  { %v1517_v40 = vmul.f32 -1.442695, %v771_v39  ;;  %v1001_v39 = vld [vmem:[#allocation2 + $0x8] sm:$0x3] }
 0x464   :  { %2067 = vpow2.f32 %v1517_v40 }
 0x46e   :  { %v2068_v41 = vpop.eup %2067 }
 0x46f   :  { %v775_v42 = vadd.f32 1.0, %v2068_v41 }
 0x471   :  { %2069 = vrcp.f32 %v775_v42 }
 0x47b   :  { %v2070_v43 = vpop.eup %2069 }
 0x47c   :  { %v789_v49 = vsub.f32 1.0, %v2070_v43  ;;  %v795_v51 = vmul.f32 %v2070_v43, %v694_v33 }
 0x4d2   :  { %v780_v44 = vpop.permute.xlu0 %779 }
 0x4d3   :  { %v782_v45 = vmul.f32 %v2070_v43, %v780_v44 }
 0x4d5   :  { %784 = vrot.lane.b32.xlu1 %v782_v45, %s2136_s25 }
 0x547   :  { %v785_v46 = vpop.permute.xlu1 %784 }
 0x548   :  { %v787_v47 = vadd.f32 %v785_v46, %v695_v38 }
 0x54a   :  { %2071 = vtanh.f32 %v787_v47 }
 0x554   :  { %v2072_v48 = vpop.eup %2071 }
 0x555   :  { %791 = vrot.lane.b32.xlu0 %v2072_v48, %s2137_s4 }
 0x5c7   :  { %v792_v50 = vpop.permute.xlu0 %791 }
 0x5c8   :  { %v794_v52 = vmul.f32 %v792_v50, %v789_v49 }
 0x5ca   :  { %v796_v53 = vadd.f32 %v795_v51, %v794_v52 }
 0x5cc   :  { %799 = vrot.lane.b32.xlu1 %v796_v53, %s2137_s4 }
 0x63e   :  { %v800_v54 = vpop.permute.xlu1 %799 }
 0x63f   :  { %1789 = vmatmul.mubr.msk.f32.vlgmr.msra.gmra.mrb[10].mxu0 %vm595_vm2, %v800_v54 }
 0x640   :  { %2027 = vmatpush3.bf16.msra.mxu0 %v2618_v15  ;;  %1810 = vmatprep.mubr.msk.f32.mxu0 %vm2134_vm0, %v2135_v23 }
 0x641   :  { %2028 = vmatprep.subr.bf16.mxu0 %v2133_v17 }
 0x644   :  { %2030 = vmatpush3.bf16.msra.mxu0 %v2637_v22 }
 0x645   :  { %2037 = vmatprep.subr.bf16.mxu0 %v2133_v17 }
 0x712   :  { %v869_v55 = vpop.f32.mrb[10].mxu0 }
 0x713   :  { %v870_v56 = vadd.f32 %v2682_v3, %v869_v55  ;;  %v1790_v57 = vpop.f32.mrb[11].mxu0 }
 0x715   :  { %881 = vrot.lane.b32.xlu0 %v870_v56, %s2136_s25  ;;  %v873_v59 = vadd.f32 %v870_v56, %v797_v58 }
 0x717   :  { %v1519_v60 = vmul.f32 -1.442695, %v873_v59  ;;  %v1103_v59 = vld [vmem:[#allocation2 + $0xa] sm:$0x3] }
 0x719   :  { %2073 = vpow2.f32 %v1519_v60 }
 0x723   :  { %v2074_v61 = vpop.eup %2073 }
 0x724   :  { %v877_v62 = vadd.f32 1.0, %v2074_v61 }
 0x726   :  { %2075 = vrcp.f32 %v877_v62 }
 0x730   :  { %v2076_v63 = vpop.eup %2075 }
 0x731   :  { %v891_v6 = vsub.f32 1.0, %v2076_v63  ;;  %v897_v8 = vmul.f32 %v2076_v63, %v796_v53 }
 0x787   :  { %v882_v0 = vpop.permute.xlu0 %881 }
 0x788   :  { %v884_v1 = vmul.f32 %v2076_v63, %v882_v0 }
 0x78a   :  { %886 = vrot.lane.b32.xlu1 %v884_v1, %s2136_s25 }
 0x7fc   :  { %v887_v2 = vpop.permute.xlu1 %886 }
 0x7fd   :  { %v889_v4 = vadd.f32 %v887_v2, %v797_v58 }
 0x7ff   :  { %2077 = vtanh.f32 %v889_v4 }
 0x809   :  { %v2078_v5 = vpop.eup %2077 }
 0x80a   :  { %893 = vrot.lane.b32.xlu0 %v2078_v5, %s2137_s4 }
 0x87c   :  { %v894_v7 = vpop.permute.xlu0 %893 }
 0x87d   :  { %v896_v9 = vmul.f32 %v894_v7, %v891_v6 }
 0x87f   :  { %v898_v10 = vadd.f32 %v897_v8, %v896_v9 }
 0x881   :  { %901 = vrot.lane.b32.xlu1 %v898_v10, %s2137_s4 }
 0x8f3   :  { %v902_v11 = vpop.permute.xlu1 %901 }
 0x8f4   :  { %1800 = vmatmul.mubr.msk.f32.vlgmr.msra.gmra.mrb[12].mxu1 %vm595_vm2, %v902_v11 }
 0x8f5   :  { %2033 = vmatpush3.bf16.msra.mxu1 %v2618_v15  ;;  %1821 = vmatprep.mubr.msk.f32.mxu1 %vm2134_vm0, %v2135_v23 }
 0x8f6   :  { %2034 = vmatprep.subr.bf16.mxu1 %v2133_v17 }
 0x8f9   :  { %2036 = vmatpush3.bf16.msra.mxu1 %v2637_v22 }
 0x8fa   :  { %2043 = vmatprep.subr.bf16.mxu1 %v2133_v17 }
 0x9c7   :  { %v971_v12 = vpop.f32.mrb[12].mxu1 }
 0x9c8   :  { %v972_v13 = vadd.f32 %v2682_v3, %v971_v12  ;;  %v1801_v14 = vpop.f32.mrb[13].mxu1 }
 0x9c9   :  { %v1205_v14 = vld [vmem:[#allocation2 + $0xc] sm:$0x3] }
 0x9ca   :  { %983 = vrot.lane.b32.xlu0 %v972_v13, %s2136_s25  ;;  %v975_v18 = vadd.f32 %v972_v13, %v899_v16 }
 0x9cc   :  { %v1521_v19 = vmul.f32 -1.442695, %v975_v18 }
 0x9ce   :  { %2079 = vpow2.f32 %v1521_v19 }
 0x9d8   :  { %v2080_v20 = vpop.eup %2079 }
 0x9d9   :  { %v979_v21 = vadd.f32 1.0, %v2080_v20 }
 0x9db   :  { %2081 = vrcp.f32 %v979_v21 }
 0x9e5   :  { %v2082_v24 = vpop.eup %2081 }
 0x9e6   :  { %v993_v30 = vsub.f32 1.0, %v2082_v24  ;;  %v999_v32 = vmul.f32 %v2082_v24, %v898_v10 }
 0xa3c   :  { %v984_v25 = vpop.permute.xlu0 %983 }
 0xa3d   :  { %v986_v26 = vmul.f32 %v2082_v24, %v984_v25 }
 0xa3f   :  { %988 = vrot.lane.b32.xlu1 %v986_v26, %s2136_s25 }
 0xab1   :  { %v989_v27 = vpop.permute.xlu1 %988 }
 0xab2   :  { %v991_v28 = vadd.f32 %v989_v27, %v899_v16 }
 0xab4   :  { %2083 = vtanh.f32 %v991_v28 }
 0xabe   :  { %v2084_v29 = vpop.eup %2083 }
 0xabf   :  { %995 = vrot.lane.b32.xlu0 %v2084_v29, %s2137_s4 }
 0xb31   :  { %v996_v31 = vpop.permute.xlu0 %995 }
 0xb32   :  { %v998_v33 = vmul.f32 %v996_v31, %v993_v30 }
 0xb34   :  { %v1000_v34 = vadd.f32 %v999_v32, %v998_v33 }
 0xb36   :  { %1003 = vrot.lane.b32.xlu1 %v1000_v34, %s2137_s4 }
 0xba8   :  { %v1004_v35 = vpop.permute.xlu1 %1003 }
 0xba9   :  { %1811 = vmatmul.mubr.msk.f32.vlgmr.msra.gmra.mrb[12].mxu0 %vm595_vm2, %v1004_v35 }
 0xbaa   :  { %2039 = vmatpush3.bf16.msra.mxu0 %v2618_v15  ;;  %1832 = vmatprep.mubr.msk.f32.mxu0 %vm2134_vm0, %v2135_v23 }
 0xbab   :  { %2040 = vmatprep.subr.bf16.mxu0 %v2133_v17 }
 0xbae   :  { %2042 = vmatpush3.bf16.msra.mxu0 %v2637_v22 }
 0xbaf   :  { %2049 = vmatprep.subr.bf16.mxu0 %v2133_v17 }
 0xc7c   :  { %v1073_v36 = vpop.f32.mrb[12].mxu0 }
 0xc7d   :  { %v1074_v37 = vadd.f32 %v2682_v3, %v1073_v36  ;;  %v1812_v38 = vpop.f32.mrb[13].mxu0 }
 0xc7f   :  { %1085 = vrot.lane.b32.xlu0 %v1074_v37, %s2136_s25  ;;  %v1077_v40 = vadd.f32 %v1074_v37, %v1001_v39  ;;  %v1307_v37 = vld [vmem:[#allocation2 + $0xe] sm:$0x3] }
 0xc81   :  { %v1523_v41 = vmul.f32 -1.442695, %v1077_v40 }
 0xc83   :  { %2085 = vpow2.f32 %v1523_v41 }
 0xc8d   :  { %v2086_v42 = vpop.eup %2085 }
 0xc8e   :  { %v1081_v43 = vadd.f32 1.0, %v2086_v42 }
 0xc90   :  { %2087 = vrcp.f32 %v1081_v43 }
 0xc9a   :  { %v2088_v44 = vpop.eup %2087 }
 0xc9b   :  { %v1095_v50 = vsub.f32 1.0, %v2088_v44  ;;  %v1101_v52 = vmul.f32 %v2088_v44, %v1000_v34 }
 0xcf1   :  { %v1086_v45 = vpop.permute.xlu0 %1085 }
 0xcf2   :  { %v1088_v46 = vmul.f32 %v2088_v44, %v1086_v45 }
 0xcf4   :  { %1090 = vrot.lane.b32.xlu1 %v1088_v46, %s2136_s25 }
 0xd66   :  { %v1091_v47 = vpop.permute.xlu1 %1090 }
 0xd67   :  { %v1093_v48 = vadd.f32 %v1091_v47, %v1001_v39  ;;  %v1410_v47 = vld [vmem:[%s2807_s7 + $0x8] sm:$0xff] }
 0xd69   :  { %2089 = vtanh.f32 %v1093_v48  ;;  %v1411_v48 = vld [vmem:[%s2807_s7 + $0x10] sm:$0xff] }
 0xd73   :  { %v2090_v49 = vpop.eup %2089 }
 0xd74   :  { %1097 = vrot.lane.b32.xlu0 %v2090_v49, %s2137_s4 }
 0xde6   :  { %v1098_v51 = vpop.permute.xlu0 %1097 }
 0xde7   :  { %v1100_v53 = vmul.f32 %v1098_v51, %v1095_v50  ;;  %v1412_v50 = vld [vmem:[%s2807_s7 + $0x18] sm:$0xff] }
 0xde8   :  { %v2053_v51 = vpack.c.bf16 %v1412_v50, %v1411_v48 }
 0xde9   :  { %v1102_v54 = vadd.f32 %v1101_v52, %v1100_v53 }
 0xdeb   :  { %1105 = vrot.lane.b32.xlu1 %v1102_v54, %s2137_s4 }
 0xe5d   :  { %v1106_v55 = vpop.permute.xlu1 %1105 }
 0xe5e   :  { %1822 = vmatmul.mubr.msk.f32.vlgmr.msra.gmra.mrb[14].mxu1 %vm595_vm2, %v1106_v55 }
 0xe5f   :  { %2045 = vmatpush3.bf16.msra.mxu1 %v2618_v15  ;;  %1843 = vmatprep.mubr.msk.f32.mxu1 %vm2134_vm0, %v2135_v23 }
 0xe60   :  { %2046 = vmatprep.subr.bf16.mxu1 %v2133_v17 }
 0xe63   :  { %2048 = vmatpush3.bf16.msra.mxu1 %v2637_v22 }
 0xf31   :  { %v1175_v56 = vpop.f32.mrb[14].mxu1 }
 0xf32   :  { %v1176_v57 = vadd.f32 %v2682_v3, %v1175_v56  ;;  %v1823_v58 = vpop.f32.mrb[15].mxu1 }
 0xf34   :  { %1187 = vrot.lane.b32.xlu0 %v1176_v57, %s2136_s25  ;;  %v1179_v60 = vadd.f32 %v1176_v57, %v1103_v59 }
 0xf36   :  { %v1525_v61 = vmul.f32 -1.442695, %v1179_v60 }
 0xf38   :  { %2091 = vpow2.f32 %v1525_v61 }
 0xf42   :  { %v2092_v62 = vpop.eup %2091 }
 0xf43   :  { %v1183_v63 = vadd.f32 1.0, %v2092_v62 }
 0xf45   :  { %2093 = vrcp.f32 %v1183_v63 }
 0xf4f   :  { %v2094_v15 = vpop.eup %2093 }
 0xf50   :  { %v1197_v5 = vsub.f32 1.0, %v2094_v15  ;;  %v1203_v7 = vmul.f32 %v2094_v15, %v1102_v54 }
 0xfa6   :  { %v1188_v0 = vpop.permute.xlu0 %1187 }
 0xfa7   :  { %v1190_v1 = vmul.f32 %v2094_v15, %v1188_v0 }
 0xfa9   :  { %1192 = vrot.lane.b32.xlu1 %v1190_v1, %s2136_s25 }
0x101b   :  { %v1193_v2 = vpop.permute.xlu1 %1192 }
0x101c   :  { %v1195_v22 = vadd.f32 %v1193_v2, %v1103_v59  ;;  %v1530_v59 = vld [vmem:[%s2808_s8] ss:$0 sm:$0xff] }
0x101e   :  { %2095 = vtanh.f32 %v1195_v22 }
0x1028   :  { %v2096_v4 = vpop.eup %2095 }
0x1029   :  { %1199 = vrot.lane.b32.xlu0 %v2096_v4, %s2137_s4 }
0x109b   :  { %v1200_v6 = vpop.permute.xlu0 %1199 }
0x109c   :  { %v1202_v8 = vmul.f32 %v1200_v6, %v1197_v5 }
0x109e   :  { %v1204_v9 = vadd.f32 %v1203_v7, %v1202_v8 }
0x10a0   :  { %1207 = vrot.lane.b32.xlu1 %v1204_v9, %s2137_s4 }
0x1112   :  { %v1208_v10 = vpop.permute.xlu1 %1207 }
0x1113   :  { %1833 = vmatmul.mubr.msk.f32.vlgmr.msra.gmra.mrb[14].mxu0 %vm595_vm2, %v1208_v10 }
0x1114   :  { %1854 = vmatprep.mubr.msk.f32.mxu0 %vm2134_vm0, %v2135_v23 }
0x11e6   :  { %v1277_v11 = vpop.f32.mrb[14].mxu0 }
0x11e7   :  { %v1278_v12 = vadd.f32 %v2682_v3, %v1277_v11  ;;  %v1834_v13 = vpop.f32.mrb[15].mxu0 }
0x11e9   :  { %1289 = vrot.lane.b32.xlu0 %v1278_v12, %s2136_s25  ;;  %v1281_v16 = vadd.f32 %v1278_v12, %v1205_v14 }
0x11eb   :  { %v1527_v18 = vmul.f32 -1.442695, %v1281_v16 }
0x11ed   :  { %2097 = vpow2.f32 %v1527_v18 }
0x11f7   :  { %v2098_v19 = vpop.eup %2097 }
0x11f8   :  { %v1285_v20 = vadd.f32 1.0, %v2098_v19 }
0x11fa   :  { %2099 = vrcp.f32 %v1285_v20 }
0x1204   :  { %v2100_v21 = vpop.eup %2099 }
0x1205   :  { %v1299_v28 = vsub.f32 1.0, %v2100_v21  ;;  %v1305_v30 = vmul.f32 %v2100_v21, %v1204_v9 }
0x125b   :  { %v1290_v24 = vpop.permute.xlu0 %1289 }
0x125c   :  { %v1292_v25 = vmul.f32 %v2100_v21, %v1290_v24 }
0x125e   :  { %1294 = vrot.lane.b32.xlu1 %v1292_v25, %s2136_s25 }
0x12d0   :  { %v1295_v26 = vpop.permute.xlu1 %1294 }
0x12d1   :  { %v1297_v23 = vadd.f32 %v1295_v26, %v1205_v14 }
0x12d3   :  { %2101 = vtanh.f32 %v1297_v23 }
0x12dd   :  { %v2102_v27 = vpop.eup %2101 }
0x12de   :  { %1301 = vrot.lane.b32.xlu0 %v2102_v27, %s2137_s4 }
0x1350   :  { %v1302_v29 = vpop.permute.xlu0 %1301 }
0x1351   :  { %v1304_v31 = vmul.f32 %v1302_v29, %v1299_v28 }
0x1353   :  { %v1306_v32 = vadd.f32 %v1305_v30, %v1304_v31 }
0x1355   :  { %1309 = vrot.lane.b32.xlu1 %v1306_v32, %s2137_s4 }
0x13c7   :  { %v1310_v33 = vpop.permute.xlu1 %1309 }
0x13c8   :  { %1844 = vmatmul.mubr.msk.f32.vlgmr.msra.gmra.mrb[16].mxu1 %vm595_vm2, %v1310_v33 }
0x149b   :  { %v1379_v34 = vpop.f32.mrb[16].mxu1 }
0x149c   :  { %v1380_v35 = vadd.f32 %v2682_v3, %v1379_v34  ;;  %v1845_v36 = vpop.f32.mrb[17].mxu1  ;;  %v1409_v3 = vld [vmem:[%s2807_s7] sm:$0xff] }
0x149d   :  { %v2050_v49 = vpack.c.bf16 %v1410_v47, %v1409_v3 }
0x149e   :  { %1391 = vrot.lane.b32.xlu0 %v1380_v35, %s2136_s25  ;;  %v1383_v38 = vadd.f32 %v1380_v35, %v1307_v37 }
0x149f   :  { %2051 = vmatpush3.bf16.msra.mxu0 %v2050_v49 }
0x14a0   :  { %v1529_v39 = vmul.f32 -1.442695, %v1383_v38  ;;  %2052 = vmatprep.subr.bf16.mxu0 %v2133_v17 }
0x14a2   :  { %2103 = vpow2.f32 %v1529_v39 }
0x14a3   :  { %2054 = vmatpush3.bf16.msra.mxu0 %v2053_v51 }
0x14ac   :  { %v2104_v40 = vpop.eup %2103 }
0x14ad   :  { %v1387_v41 = vadd.f32 1.0, %v2104_v40 }
0x14af   :  { %2105 = vrcp.f32 %v1387_v41 }
0x14b9   :  { %v2106_v42 = vpop.eup %2105 }
0x14ba   :  { %v1401_v53 = vsub.f32 1.0, %v2106_v42  ;;  %v1407_v55 = vmul.f32 %v2106_v42, %v1306_v32 }
0x1510   :  { %v1392_v43 = vpop.permute.xlu0 %1391 }
0x1511   :  { %v1394_v44 = vmul.f32 %v2106_v42, %v1392_v43 }
0x1513   :  { %1396 = vrot.lane.b32.xlu1 %v1394_v44, %s2136_s25 }
0x1585   :  { %v1397_v45 = vpop.permute.xlu1 %1396 }
0x1586   :  { %v1399_v46 = vadd.f32 %v1397_v45, %v1307_v37 }
0x1588   :  { %2107 = vtanh.f32 %v1399_v46 }
0x1592   :  { %v2108_v52 = vpop.eup %2107 }
0x1593   :  { %1403 = vrot.lane.b32.xlu0 %v2108_v52, %s2137_s4 }
0x1605   :  { %v1404_v54 = vpop.permute.xlu0 %1403 }
0x1606   :  { %v1406_v56 = vmul.f32 %v1404_v54, %v1401_v53 }
0x1608   :  { %v1408_v57 = vadd.f32 %v1407_v55, %v1406_v56 }
0x160a   :  { %1421 = vrot.lane.b32.xlu1 %v1408_v57, %s2137_s4 }
0x167c   :  { %v1422_v58 = vpop.permute.xlu1 %1421 }
0x167d   :  { %1855 = vmatmul.mubr.msk.f32.vlgmr.msra.gmra.mrb[16].mxu0 %vm595_vm2, %v1422_v58 }
0x1750   :  { %v1491_v17 = vpop.f32.mrb[16].mxu0 }
0x1751   :  { %v1492_v60 = vadd.f32 %v1530_v59, %v1491_v17  ;;  %v1856_v61 = vpop.f32.mrb[17].mxu0 }
0x1753   :  { %1495 = vst [vmem:[#allocation3] sm:$0x3] %v1492_v60 }
0x1754   :  { %2120 = shalt.err (!%p2117_p4)
}
0x1755   :  { %s2121_s1 = scalar_lea.hbm %s2809_s9, 32 }
0x1756   :  { %p2122_p5 = scmp.ne.s32.totalorder %s2809_s9, %s2121_s1  ;;  %p2125_p6 = scmp.lt.u32.totalorder %s2121_s1, %s2809_s9 }
0x1758   :  { %p2127_p7 = pnand %p2125_p6, %p2122_p5 }
0x175a   :  { %2130 = shalt.err (!%p2127_p7)
}
0x175b   :  { %1505 = dma.vmem_to_hbm [thread:$0]  %s1503_s14, 32, %s2809_s9, [#allocation4]  }
0x175c   :  { %2131 = dma.done.wait [#allocation4], 32  }
0x175d   :  { %2132 = vsyncadd [#allocation4], 4294967264 }
0x175e   :  { %1509 = vsyncpa [#allocation4], 1 }

</bundles_post_ra>
